<compile_context>
chip_gen: v6e
topology: v6e:2x2x1
jax: 0.10.0
libtpu: 0.0.40
codegen_flags: <defaults>
</compile_context>

<pallas_src>
import jax
import jax.numpy as jnp
import numpy as np
from jax import lax
from jax.experimental import pallas as pl
from jax.experimental.pallas import tpu as pltpu


# ----------------------------------------------------------------------------
# Kernel
# ----------------------------------------------------------------------------
def _make_recurrent_kernel(L, T, B, H):
    def kernel(*refs):
        # inputs : obs_tm[T*B, D] (time-major rows: t*B + b), h0[B, L*H],
        #          c0[B, L*H], fc1_w[D, H], fc1_b[1, H],
        #          (w_ih[H, 4H], w_hh[H, 4H], b[1, 4H]) * L   -- gates (i,f,o,g)
        #          fc2_w[H, A], fc2_b[1, A]
        # outputs: logits[B, A], state_out[B, 2*L*H]  (= [h_0..h_{L-1}, c_0..c_{L-1}])
        obs_ref, h0_ref, c0_ref = refs[0], refs[1], refs[2]
        fc1_w_ref, fc1_b_ref = refs[3], refs[4]
        lstm_refs = refs[5:5 + 3 * L]
        fc2_w_ref, fc2_b_ref = refs[5 + 3 * L], refs[6 + 3 * L]
        logits_ref = refs[7 + 3 * L]
        state_ref = refs[8 + 3 * L]

        # ---- fc1 for every (t, b) row in one matmul; bias broadcast once ----
        x_tm = (jnp.dot(obs_ref[...], fc1_w_ref[...],
                        preferred_element_type=jnp.float32)
                + fc1_b_ref[...])                       # [T*B, H], time-major

        # Load layer weights once (tiny, VMEM/vreg resident).
        w_ih = [lstm_refs[3 * l][...] for l in range(L)]     # [H, 4H]
        w_hh = [lstm_refs[3 * l + 1][...] for l in range(L)] # [H, 4H]
        b_g = [lstm_refs[3 * l + 2][...] for l in range(L)]  # [1, 4H]

        # Layer-0 input+bias gate contribution for ALL timesteps: ONE matmul,
        # off the recurrent critical path.
        gx0 = (jnp.dot(x_tm, w_ih[0], preferred_element_type=jnp.float32)
               + b_g[0])                                # [T*B, 4H]

        h0_all = h0_ref[...]                            # [B, L*H]
        c0_all = c0_ref[...]
        hs = [h0_all[:, l * H:(l + 1) * H] for l in range(L)]
        cs = [c0_all[:, l * H:(l + 1) * H] for l in range(L)]

        H3 = 3 * H

        def lstm_cell(g, c):
            # gates packed (i, f, o, g): sigmoid only on [0:3H], tanh on [3H:4H]
            sg = jax.nn.sigmoid(g[:, :H3])
            gt = jnp.tanh(g[:, H3:])
            c_new = sg[:, H:2 * H] * c + sg[:, 0:H] * gt
            h_new = sg[:, 2 * H:H3] * jnp.tanh(c_new)
            return h_new, c_new

        # Wavefront: time OUTER, layers INNER, fully unrolled (one basic block)
        # so layer-(l+1) step t overlaps layer-l step t+1 in the scheduler.
        # TODO(synk): optional micro-opt -- keep W_hh resident in the MXU via
        # pltpu.matmul_push_rhs/matmul_acc_lhs/matmul_pop (skipped: fragile
        # lowering at these [2,32]x[32,128] shapes).
        for t in range(T):
            inp = None
            for l in range(L):
                if l == 0:
                    g = gx0[t * B:(t + 1) * B, :] + jnp.dot(
                        hs[0], w_hh[0], preferred_element_type=jnp.float32)
                else:
                    g = (jnp.dot(inp, w_ih[l],
                                 preferred_element_type=jnp.float32)
                         + b_g[l]
                         + jnp.dot(hs[l], w_hh[l],
                                   preferred_element_type=jnp.float32))
                hs[l], cs[l] = lstm_cell(g, cs[l])
                inp = hs[l]

        # fc2 on the top layer's last-timestep output.
        logits_ref[...] = (jnp.dot(hs[L - 1], fc2_w_ref[...],
                                   preferred_element_type=jnp.float32)
                           + fc2_b_ref[...])

        # Lane-dense single store of all recurrent state ([B, 2*L*H] = [2,128]).
        state_ref[...] = jnp.concatenate(hs + cs, axis=1)

    return kernel


# ----------------------------------------------------------------------------
# Wrapper (plain JAX glue: free reshapes + one tiny transpose, gate repacking).
# ----------------------------------------------------------------------------
def _repack_gates(w, H):
    # PyTorch gate column order (i, f, g, o) -> kernel order (i, f, o, g)
    return jnp.concatenate(
        [w[..., 0:2 * H], w[..., 3 * H:4 * H], w[..., 2 * H:3 * H]], axis=-1)


def recurrent_forward(obs, params, state=None):
    if obs.ndim == 2:                       # eval mode: [B, D] -> [B, 1, D]
        obs = obs[:, None, :]
    obs = obs.astype(jnp.float32)
    B, T, D = obs.shape
    H = params["fc1_w"].shape[1]
    A = params["fc2_w"].shape[1]
    L = len(params["lstm"])

    if state is None:
        h0 = jnp.zeros((B, L * H), jnp.float32)
        c0 = jnp.zeros((B, L * H), jnp.float32)
    else:
        h0 = state["hidden"].astype(jnp.float32).reshape(B, L * H)
        c0 = state["cell"].astype(jnp.float32).reshape(B, L * H)

    # Time-major rows (row = t*B + b): every per-step slice inside the kernel
    # is then a contiguous static sublane window; transpose is free at [2,8,16].
    obs_tm = obs.swapaxes(0, 1).reshape(T * B, D)

    inputs = [obs_tm, h0, c0,
              params["fc1_w"], params["fc1_b"].reshape(1, H)]
    for (w_ih, w_hh, b) in params["lstm"]:
        inputs += [_repack_gates(w_ih, H),
                   _repack_gates(w_hh, H),
                   _repack_gates(b, H).reshape(1, 4 * H)]
    inputs += [params["fc2_w"], params["fc2_b"].reshape(1, A)]

    vmem = pl.BlockSpec(memory_space=pltpu.MemorySpace.VMEM)
    logits, state_out = pl.pallas_call(
        _make_recurrent_kernel(L, T, B, H),
        out_shape=(jax.ShapeDtypeStruct((B, A), jnp.float32),
                   jax.ShapeDtypeStruct((B, 2 * L * H), jnp.float32)),
        in_specs=[vmem] * len(inputs),
        out_specs=(vmem, vmem),
    )(*inputs)

    # Free, view-like splits/reshapes; state is batch-first like PyTorch's
    # hidden.transpose(0, 1).
    hidden = state_out[:, :L * H].reshape(B, L, H)
    cell = state_out[:, L * H:].reshape(B, L, H)
    return logits, {"hidden": hidden, "cell": cell}


# ----------------------------------------------------------------------------
# Deterministic parameter init (PyTorch default: U(-1/sqrt(fan), 1/sqrt(fan))).
# Weights stored pre-transposed as [in, out]; LSTM per-layer bias = b_ih + b_hh.
# Gate column order is PyTorch's (i, f, g, o); the wrapper repacks for the kernel.
# ----------------------------------------------------------------------------
def init_params(key, state_dim, action_dim, hidden, layer_num):
    def uniform(k, shape, fan_in):
        bound = 1.0 / np.sqrt(fan_in)
        return jax.random.uniform(k, shape, jnp.float32, -bound, bound)

    keys = jax.random.split(key, 4 + 3 * layer_num)
    params = {
        "fc1_w": uniform(keys[0], (state_dim, hidden), state_dim),
        "fc1_b": uniform(keys[1], (hidden,), state_dim),
        "fc2_w": uniform(keys[2], (hidden, action_dim), hidden),
        "fc2_b": uniform(keys[3], (action_dim,), hidden),
        "lstm": [],
    }
    for l in range(layer_num):
        in_dim = hidden  # LSTM input_size == hidden_size in this module
        k0, k1, k2 = keys[4 + 3 * l], keys[5 + 3 * l], keys[6 + 3 * l]
        params["lstm"].append((
            uniform(k0, (in_dim, 4 * hidden), hidden),
            uniform(k1, (hidden, 4 * hidden), hidden),
            uniform(k2, (4 * hidden,), hidden),
        ))
    return params


# ----------------------------------------------------------------------------
# Pure-JAX reference (torch.nn.LSTM semantics, full-f32 matmuls, PyTorch gate order).
# ----------------------------------------------------------------------------
def reference_forward(obs, params, state=None):
    if obs.ndim == 2:
        obs = obs[:, None, :]
    obs = obs.astype(jnp.float32)
    hp = lax.Precision.HIGHEST
    x = jnp.matmul(obs, params["fc1_w"], precision=hp) + params["fc1_b"]
    B, T, H = x.shape
    L = len(params["lstm"])
    if state is None:
        h0 = jnp.zeros((B, L, H), jnp.float32)
        c0 = jnp.zeros((B, L, H), jnp.float32)
    else:
        h0 = state["hidden"].astype(jnp.float32)
        c0 = state["cell"].astype(jnp.float32)
    hs, cs = [], []
    layer_in = x
    for l, (w_ih, w_hh, b) in enumerate(params["lstm"]):
        h, c = h0[:, l, :], c0[:, l, :]
        outs = []
        for t in range(T):
            gates = (jnp.matmul(layer_in[:, t], w_ih, precision=hp)
                     + jnp.matmul(h, w_hh, precision=hp) + b)
            i_g = jax.nn.sigmoid(gates[:, 0:H])
            f_g = jax.nn.sigmoid(gates[:, H:2 * H])
            g_g = jnp.tanh(gates[:, 2 * H:3 * H])
            o_g = jax.nn.sigmoid(gates[:, 3 * H:4 * H])
            c = f_g * c + i_g * g_g
            h = o_g * jnp.tanh(c)
            outs.append(h)
        layer_in = jnp.stack(outs, axis=1)
        hs.append(h)
        cs.append(c)
    logits = (jnp.matmul(layer_in[:, -1], params["fc2_w"], precision=hp)
              + params["fc2_b"])
    return logits, {"hidden": jnp.stack(hs, axis=1), "cell": jnp.stack(cs, axis=1)}


if __name__ == "__main__":
    # Recurrent(layer_num=2, state_shape=16, action_shape=4,
    #           hidden_layer_size=32); training-mode obs [bsz, len, dim].
    B, T, STATE_DIM, ACTION_DIM, HIDDEN, LAYERS = 2, 8, 16, 4, 32, 2

    key = jax.random.PRNGKey(0)
    k_params, k_obs, k_obs2 = jax.random.split(key, 3)
    params = init_params(k_params, STATE_DIM, ACTION_DIM, HIDDEN, LAYERS)
    obs = jax.random.normal(k_obs, (B, T, STATE_DIM), jnp.float32)

    # Headroom for default-precision MXU f32 passes and EUP transcendental
    # approximations over the 8-step recurrence (reference is Precision.HIGHEST).
    TOL = dict(rtol=2e-3, atol=2e-3)

    # --- training mode, no incoming state -----------------------------------
    logits, state = recurrent_forward(obs, params)
    jax.block_until_ready((logits, state))
    ref_logits, ref_state = reference_forward(obs, params)
    np.testing.assert_allclose(np.asarray(logits), np.asarray(ref_logits), **TOL)
    np.testing.assert_allclose(np.asarray(state["hidden"]),
                               np.asarray(ref_state["hidden"]), **TOL)
    np.testing.assert_allclose(np.asarray(state["cell"]),
                               np.asarray(ref_state["cell"]), **TOL)
    assert logits.shape == (B, ACTION_DIM)
    assert state["hidden"].shape == (B, LAYERS, HIDDEN)
    assert state["cell"].shape == (B, LAYERS, HIDDEN)

    # --- stateful rollout: feed the produced state back in ------------------
    logits2, state2 = recurrent_forward(obs, params, state=state)
    ref_logits2, ref_state2 = reference_forward(obs, params, state=state)
    jax.block_until_ready((logits2, state2))
    np.testing.assert_allclose(np.asarray(logits2), np.asarray(ref_logits2), **TOL)
    np.testing.assert_allclose(np.asarray(state2["hidden"]),
                               np.asarray(ref_state2["hidden"]), **TOL)
    np.testing.assert_allclose(np.asarray(state2["cell"]),
                               np.asarray(ref_state2["cell"]), **TOL)

    # --- evaluation mode: obs is [bsz, dim] ----------------------------------
    obs_eval = jax.random.normal(k_obs2, (B, STATE_DIM), jnp.float32)
    logits3, state3 = recurrent_forward(obs_eval, params)
    jax.block_until_ready((logits3, state3))
    ref_logits3, ref_state3 = reference_forward(obs_eval, params)
    np.testing.assert_allclose(np.asarray(logits3), np.asarray(ref_logits3), **TOL)
    np.testing.assert_allclose(np.asarray(state3["hidden"]),
                               np.asarray(ref_state3["hidden"]), **TOL)
    assert logits3.shape == (B, ACTION_DIM)

    print("KERNEL_OK")
</pallas_src>

<mosaic_0001>
module attributes {stable_mosaic.version = 11 : i64} {
  func.func @kernel(%arg0: memref<16x16xf32, #tpu.memory_space<vmem>>, %arg1: memref<2x64xf32, #tpu.memory_space<vmem>>, %arg2: memref<2x64xf32, #tpu.memory_space<vmem>>, %arg3: memref<16x32xf32, #tpu.memory_space<vmem>>, %arg4: memref<1x32xf32, #tpu.memory_space<vmem>>, %arg5: memref<32x128xf32, #tpu.memory_space<vmem>>, %arg6: memref<32x128xf32, #tpu.memory_space<vmem>>, %arg7: memref<1x128xf32, #tpu.memory_space<vmem>>, %arg8: memref<32x128xf32, #tpu.memory_space<vmem>>, %arg9: memref<32x128xf32, #tpu.memory_space<vmem>>, %arg10: memref<1x128xf32, #tpu.memory_space<vmem>>, %arg11: memref<32x4xf32, #tpu.memory_space<vmem>>, %arg12: memref<1x4xf32, #tpu.memory_space<vmem>>, %arg13: memref<2x4xf32, #tpu.memory_space<vmem>>, %arg14: memref<2x128xf32, #tpu.memory_space<vmem>>) attributes {dimension_semantics = [], scalar_prefetch = 0 : i64, scratch_operands = 0 : i64, tpu.core_type = #tpu.core_type<tc>} {
    %c0 = arith.constant 0 : index
    %c0_0 = arith.constant 0 : index
    %0 = vector.load %arg0[%c0, %c0_0] : memref<16x16xf32, #tpu.memory_space<vmem>>, vector<16x16xf32>
    %c0_1 = arith.constant 0 : index
    %c0_2 = arith.constant 0 : index
    %1 = vector.load %arg3[%c0_1, %c0_2] : memref<16x32xf32, #tpu.memory_space<vmem>>, vector<16x32xf32>
    %cst = arith.constant dense<0.000000e+00> : vector<16x32xf32>
    %2 = tpu.matmul %0, %1, %cst {dimension_numbers = #tpu.dot_dimension_numbers<[1], [0], [0], [1], [0, 0, 1, 1], [], []>} : vector<16x16xf32>, vector<16x32xf32>, vector<16x32xf32> -> vector<16x32xf32>
    %c0_3 = arith.constant 0 : index
    %c0_4 = arith.constant 0 : index
    %3 = vector.load %arg4[%c0_3, %c0_4] : memref<1x32xf32, #tpu.memory_space<vmem>>, vector<1x32xf32>
    %4 = vector.broadcast %3 : vector<1x32xf32> to vector<16x32xf32>
    %5 = arith.addf %2, %4 : vector<16x32xf32>
    %c0_5 = arith.constant 0 : index
    %c0_6 = arith.constant 0 : index
    %6 = vector.load %arg5[%c0_5, %c0_6] : memref<32x128xf32, #tpu.memory_space<vmem>>, vector<32x128xf32>
    %c0_7 = arith.constant 0 : index
    %c0_8 = arith.constant 0 : index
    %7 = vector.load %arg8[%c0_7, %c0_8] : memref<32x128xf32, #tpu.memory_space<vmem>>, vector<32x128xf32>
    %c0_9 = arith.constant 0 : index
    %c0_10 = arith.constant 0 : index
    %8 = vector.load %arg6[%c0_9, %c0_10] : memref<32x128xf32, #tpu.memory_space<vmem>>, vector<32x128xf32>
    %c0_11 = arith.constant 0 : index
    %c0_12 = arith.constant 0 : index
    %9 = vector.load %arg9[%c0_11, %c0_12] : memref<32x128xf32, #tpu.memory_space<vmem>>, vector<32x128xf32>
    %c0_13 = arith.constant 0 : index
    %c0_14 = arith.constant 0 : index
    %10 = vector.load %arg7[%c0_13, %c0_14] : memref<1x128xf32, #tpu.memory_space<vmem>>, vector<1x128xf32>
    %c0_15 = arith.constant 0 : index
    %c0_16 = arith.constant 0 : index
    %11 = vector.load %arg10[%c0_15, %c0_16] : memref<1x128xf32, #tpu.memory_space<vmem>>, vector<1x128xf32>
    %cst_17 = arith.constant dense<0.000000e+00> : vector<16x128xf32>
    %12 = tpu.matmul %5, %6, %cst_17 {dimension_numbers = #tpu.dot_dimension_numbers<[1], [0], [0], [1], [0, 0, 1, 1], [], []>} : vector<16x32xf32>, vector<32x128xf32>, vector<16x128xf32> -> vector<16x128xf32>
    %13 = vector.broadcast %10 : vector<1x128xf32> to vector<16x128xf32>
    %14 = arith.addf %12, %13 : vector<16x128xf32>
    %c0_18 = arith.constant 0 : index
    %c0_19 = arith.constant 0 : index
    %15 = vector.load %arg1[%c0_18, %c0_19] : memref<2x64xf32, #tpu.memory_space<vmem>>, vector<2x64xf32>
    %c0_20 = arith.constant 0 : index
    %c0_21 = arith.constant 0 : index
    %16 = vector.load %arg2[%c0_20, %c0_21] : memref<2x64xf32, #tpu.memory_space<vmem>>, vector<2x64xf32>
    %17 = vector.extract_strided_slice %15 {offsets = [0, 0], sizes = [2, 32], strides = [1, 1]} : vector<2x64xf32> to vector<2x32xf32>
    %18 = vector.extract_strided_slice %15 {offsets = [0, 32], sizes = [2, 32], strides = [1, 1]} : vector<2x64xf32> to vector<2x32xf32>
    %19 = vector.extract_strided_slice %16 {offsets = [0, 0], sizes = [2, 32], strides = [1, 1]} : vector<2x64xf32> to vector<2x32xf32>
    %20 = vector.extract_strided_slice %16 {offsets = [0, 32], sizes = [2, 32], strides = [1, 1]} : vector<2x64xf32> to vector<2x32xf32>
    %21 = vector.extract_strided_slice %14 {offsets = [0, 0], sizes = [2, 128], strides = [1, 1]} : vector<16x128xf32> to vector<2x128xf32>
    %cst_22 = arith.constant dense<0.000000e+00> : vector<2x128xf32>
    %22 = tpu.matmul %17, %8, %cst_22 {dimension_numbers = #tpu.dot_dimension_numbers<[1], [0], [0], [1], [0, 0, 1, 1], [], []>} : vector<2x32xf32>, vector<32x128xf32>, vector<2x128xf32> -> vector<2x128xf32>
    %23 = arith.addf %21, %22 : vector<2x128xf32>
    %24 = vector.extract_strided_slice %23 {offsets = [0, 0], sizes = [2, 96], strides = [1, 1]} : vector<2x128xf32> to vector<2x96xf32>
    %25 = arith.negf %24 : vector<2x96xf32>
    %26 = math.exp %25 : vector<2x96xf32>
    %cst_23 = arith.constant 1.000000e+00 : f32
    %27 = vector.broadcast %cst_23 : f32 to vector<2x96xf32>
    %28 = arith.addf %27, %26 : vector<2x96xf32>
    %29 = arith.divf %27, %28 : vector<2x96xf32>
    %30 = vector.extract_strided_slice %23 {offsets = [0, 96], sizes = [2, 32], strides = [1, 1]} : vector<2x128xf32> to vector<2x32xf32>
    %31 = math.tanh %30 : vector<2x32xf32>
    %32 = vector.extract_strided_slice %29 {offsets = [0, 32], sizes = [2, 32], strides = [1, 1]} : vector<2x96xf32> to vector<2x32xf32>
    %33 = arith.mulf %32, %19 : vector<2x32xf32>
    %34 = vector.extract_strided_slice %29 {offsets = [0, 0], sizes = [2, 32], strides = [1, 1]} : vector<2x96xf32> to vector<2x32xf32>
    %35 = arith.mulf %34, %31 : vector<2x32xf32>
    %36 = arith.addf %33, %35 : vector<2x32xf32>
    %37 = vector.extract_strided_slice %29 {offsets = [0, 64], sizes = [2, 32], strides = [1, 1]} : vector<2x96xf32> to vector<2x32xf32>
    %38 = math.tanh %36 : vector<2x32xf32>
    %39 = arith.mulf %37, %38 : vector<2x32xf32>
    %cst_24 = arith.constant dense<0.000000e+00> : vector<2x128xf32>
    %40 = tpu.matmul %39, %7, %cst_24 {dimension_numbers = #tpu.dot_dimension_numbers<[1], [0], [0], [1], [0, 0, 1, 1], [], []>} : vector<2x32xf32>, vector<32x128xf32>, vector<2x128xf32> -> vector<2x128xf32>
    %41 = vector.broadcast %11 : vector<1x128xf32> to vector<2x128xf32>
    %42 = arith.addf %40, %41 : vector<2x128xf32>
    %cst_25 = arith.constant dense<0.000000e+00> : vector<2x128xf32>
    %43 = tpu.matmul %18, %9, %cst_25 {dimension_numbers = #tpu.dot_dimension_numbers<[1], [0], [0], [1], [0, 0, 1, 1], [], []>} : vector<2x32xf32>, vector<32x128xf32>, vector<2x128xf32> -> vector<2x128xf32>
    %44 = arith.addf %42, %43 : vector<2x128xf32>
    %45 = vector.extract_strided_slice %44 {offsets = [0, 0], sizes = [2, 96], strides = [1, 1]} : vector<2x128xf32> to vector<2x96xf32>
    %46 = arith.negf %45 : vector<2x96xf32>
    %47 = math.exp %46 : vector<2x96xf32>
    %cst_26 = arith.constant 1.000000e+00 : f32
    %48 = vector.broadcast %cst_26 : f32 to vector<2x96xf32>
    %49 = arith.addf %48, %47 : vector<2x96xf32>
    %50 = arith.divf %48, %49 : vector<2x96xf32>
    %51 = vector.extract_strided_slice %44 {offsets = [0, 96], sizes = [2, 32], strides = [1, 1]} : vector<2x128xf32> to vector<2x32xf32>
    %52 = math.tanh %51 : vector<2x32xf32>
    %53 = vector.extract_strided_slice %50 {offsets = [0, 32], sizes = [2, 32], strides = [1, 1]} : vector<2x96xf32> to vector<2x32xf32>
    %54 = arith.mulf %53, %20 : vector<2x32xf32>
    %55 = vector.extract_strided_slice %50 {offsets = [0, 0], sizes = [2, 32], strides = [1, 1]} : vector<2x96xf32> to vector<2x32xf32>
    %56 = arith.mulf %55, %52 : vector<2x32xf32>
    %57 = arith.addf %54, %56 : vector<2x32xf32>
    %58 = vector.extract_strided_slice %50 {offsets = [0, 64], sizes = [2, 32], strides = [1, 1]} : vector<2x96xf32> to vector<2x32xf32>
    %59 = math.tanh %57 : vector<2x32xf32>
    %60 = arith.mulf %58, %59 : vector<2x32xf32>
    %61 = vector.extract_strided_slice %14 {offsets = [2, 0], sizes = [2, 128], strides = [1, 1]} : vector<16x128xf32> to vector<2x128xf32>
    %cst_27 = arith.constant dense<0.000000e+00> : vector<2x128xf32>
    %62 = tpu.matmul %39, %8, %cst_27 {dimension_numbers = #tpu.dot_dimension_numbers<[1], [0], [0], [1], [0, 0, 1, 1], [], []>} : vector<2x32xf32>, vector<32x128xf32>, vector<2x128xf32> -> vector<2x128xf32>
    %63 = arith.addf %61, %62 : vector<2x128xf32>
    %64 = vector.extract_strided_slice %63 {offsets = [0, 0], sizes = [2, 96], strides = [1, 1]} : vector<2x128xf32> to vector<2x96xf32>
    %65 = arith.negf %64 : vector<2x96xf32>
    %66 = math.exp %65 : vector<2x96xf32>
    %cst_28 = arith.constant 1.000000e+00 : f32
    %67 = vector.broadcast %cst_28 : f32 to vector<2x96xf32>
    %68 = arith.addf %67, %66 : vector<2x96xf32>
    %69 = arith.divf %67, %68 : vector<2x96xf32>
    %70 = vector.extract_strided_slice %63 {offsets = [0, 96], sizes = [2, 32], strides = [1, 1]} : vector<2x128xf32> to vector<2x32xf32>
    %71 = math.tanh %70 : vector<2x32xf32>
    %72 = vector.extract_strided_slice %69 {offsets = [0, 32], sizes = [2, 32], strides = [1, 1]} : vector<2x96xf32> to vector<2x32xf32>
    %73 = arith.mulf %72, %36 : vector<2x32xf32>
    %74 = vector.extract_strided_slice %69 {offsets = [0, 0], sizes = [2, 32], strides = [1, 1]} : vector<2x96xf32> to vector<2x32xf32>
    %75 = arith.mulf %74, %71 : vector<2x32xf32>
    %76 = arith.addf %73, %75 : vector<2x32xf32>
    %77 = vector.extract_strided_slice %69 {offsets = [0, 64], sizes = [2, 32], strides = [1, 1]} : vector<2x96xf32> to vector<2x32xf32>
    %78 = math.tanh %76 : vector<2x32xf32>
    %79 = arith.mulf %77, %78 : vector<2x32xf32>
    %cst_29 = arith.constant dense<0.000000e+00> : vector<2x128xf32>
    %80 = tpu.matmul %79, %7, %cst_29 {dimension_numbers = #tpu.dot_dimension_numbers<[1], [0], [0], [1], [0, 0, 1, 1], [], []>} : vector<2x32xf32>, vector<32x128xf32>, vector<2x128xf32> -> vector<2x128xf32>
    %81 = vector.broadcast %11 : vector<1x128xf32> to vector<2x128xf32>
    %82 = arith.addf %80, %81 : vector<2x128xf32>
    %cst_30 = arith.constant dense<0.000000e+00> : vector<2x128xf32>
    %83 = tpu.matmul %60, %9, %cst_30 {dimension_numbers = #tpu.dot_dimension_numbers<[1], [0], [0], [1], [0, 0, 1, 1], [], []>} : vector<2x32xf32>, vector<32x128xf32>, vector<2x128xf32> -> vector<2x128xf32>
    %84 = arith.addf %82, %83 : vector<2x128xf32>
    %85 = vector.extract_strided_slice %84 {offsets = [0, 0], sizes = [2, 96], strides = [1, 1]} : vector<2x128xf32> to vector<2x96xf32>
    %86 = arith.negf %85 : vector<2x96xf32>
    %87 = math.exp %86 : vector<2x96xf32>
    %cst_31 = arith.constant 1.000000e+00 : f32
    %88 = vector.broadcast %cst_31 : f32 to vector<2x96xf32>
    %89 = arith.addf %88, %87 : vector<2x96xf32>
    %90 = arith.divf %88, %89 : vector<2x96xf32>
    %91 = vector.extract_strided_slice %84 {offsets = [0, 96], sizes = [2, 32], strides = [1, 1]} : vector<2x128xf32> to vector<2x32xf32>
    %92 = math.tanh %91 : vector<2x32xf32>
    %93 = vector.extract_strided_slice %90 {offsets = [0, 32], sizes = [2, 32], strides = [1, 1]} : vector<2x96xf32> to vector<2x32xf32>
    %94 = arith.mulf %93, %57 : vector<2x32xf32>
    %95 = vector.extract_strided_slice %90 {offsets = [0, 0], sizes = [2, 32], strides = [1, 1]} : vector<2x96xf32> to vector<2x32xf32>
    %96 = arith.mulf %95, %92 : vector<2x32xf32>
    %97 = arith.addf %94, %96 : vector<2x32xf32>
    %98 = vector.extract_strided_slice %90 {offsets = [0, 64], sizes = [2, 32], strides = [1, 1]} : vector<2x96xf32> to vector<2x32xf32>
    %99 = math.tanh %97 : vector<2x32xf32>
    %100 = arith.mulf %98, %99 : vector<2x32xf32>
    %101 = vector.extract_strided_slice %14 {offsets = [4, 0], sizes = [2, 128], strides = [1, 1]} : vector<16x128xf32> to vector<2x128xf32>
    %cst_32 = arith.constant dense<0.000000e+00> : vector<2x128xf32>
    %102 = tpu.matmul %79, %8, %cst_32 {dimension_numbers = #tpu.dot_dimension_numbers<[1], [0], [0], [1], [0, 0, 1, 1], [], []>} : vector<2x32xf32>, vector<32x128xf32>, vector<2x128xf32> -> vector<2x128xf32>
    %103 = arith.addf %101, %102 : vector<2x128xf32>
    %104 = vector.extract_strided_slice %103 {offsets = [0, 0], sizes = [2, 96], strides = [1, 1]} : vector<2x128xf32> to vector<2x96xf32>
    %105 = arith.negf %104 : vector<2x96xf32>
    %106 = math.exp %105 : vector<2x96xf32>
    %cst_33 = arith.constant 1.000000e+00 : f32
    %107 = vector.broadcast %cst_33 : f32 to vector<2x96xf32>
    %108 = arith.addf %107, %106 : vector<2x96xf32>
    %109 = arith.divf %107, %108 : vector<2x96xf32>
    %110 = vector.extract_strided_slice %103 {offsets = [0, 96], sizes = [2, 32], strides = [1, 1]} : vector<2x128xf32> to vector<2x32xf32>
    %111 = math.tanh %110 : vector<2x32xf32>
    %112 = vector.extract_strided_slice %109 {offsets = [0, 32], sizes = [2, 32], strides = [1, 1]} : vector<2x96xf32> to vector<2x32xf32>
    %113 = arith.mulf %112, %76 : vector<2x32xf32>
    %114 = vector.extract_strided_slice %109 {offsets = [0, 0], sizes = [2, 32], strides = [1, 1]} : vector<2x96xf32> to vector<2x32xf32>
    %115 = arith.mulf %114, %111 : vector<2x32xf32>
    %116 = arith.addf %113, %115 : vector<2x32xf32>
    %117 = vector.extract_strided_slice %109 {offsets = [0, 64], sizes = [2, 32], strides = [1, 1]} : vector<2x96xf32> to vector<2x32xf32>
    %118 = math.tanh %116 : vector<2x32xf32>
    %119 = arith.mulf %117, %118 : vector<2x32xf32>
    %cst_34 = arith.constant dense<0.000000e+00> : vector<2x128xf32>
    %120 = tpu.matmul %119, %7, %cst_34 {dimension_numbers = #tpu.dot_dimension_numbers<[1], [0], [0], [1], [0, 0, 1, 1], [], []>} : vector<2x32xf32>, vector<32x128xf32>, vector<2x128xf32> -> vector<2x128xf32>
    %121 = vector.broadcast %11 : vector<1x128xf32> to vector<2x128xf32>
    %122 = arith.addf %120, %121 : vector<2x128xf32>
    %cst_35 = arith.constant dense<0.000000e+00> : vector<2x128xf32>
    %123 = tpu.matmul %100, %9, %cst_35 {dimension_numbers = #tpu.dot_dimension_numbers<[1], [0], [0], [1], [0, 0, 1, 1], [], []>} : vector<2x32xf32>, vector<32x128xf32>, vector<2x128xf32> -> vector<2x128xf32>
    %124 = arith.addf %122, %123 : vector<2x128xf32>
    %125 = vector.extract_strided_slice %124 {offsets = [0, 0], sizes = [2, 96], strides = [1, 1]} : vector<2x128xf32> to vector<2x96xf32>
    %126 = arith.negf %125 : vector<2x96xf32>
    %127 = math.exp %126 : vector<2x96xf32>
    %cst_36 = arith.constant 1.000000e+00 : f32
    %128 = vector.broadcast %cst_36 : f32 to vector<2x96xf32>
    %129 = arith.addf %128, %127 : vector<2x96xf32>
    %130 = arith.divf %128, %129 : vector<2x96xf32>
    %131 = vector.extract_strided_slice %124 {offsets = [0, 96], sizes = [2, 32], strides = [1, 1]} : vector<2x128xf32> to vector<2x32xf32>
    %132 = math.tanh %131 : vector<2x32xf32>
    %133 = vector.extract_strided_slice %130 {offsets = [0, 32], sizes = [2, 32], strides = [1, 1]} : vector<2x96xf32> to vector<2x32xf32>
    %134 = arith.mulf %133, %97 : vector<2x32xf32>
    %135 = vector.extract_strided_slice %130 {offsets = [0, 0], sizes = [2, 32], strides = [1, 1]} : vector<2x96xf32> to vector<2x32xf32>
    %136 = arith.mulf %135, %132 : vector<2x32xf32>
    %137 = arith.addf %134, %136 : vector<2x32xf32>
    %138 = vector.extract_strided_slice %130 {offsets = [0, 64], sizes = [2, 32], strides = [1, 1]} : vector<2x96xf32> to vector<2x32xf32>
    %139 = math.tanh %137 : vector<2x32xf32>
    %140 = arith.mulf %138, %139 : vector<2x32xf32>
    %141 = vector.extract_strided_slice %14 {offsets = [6, 0], sizes = [2, 128], strides = [1, 1]} : vector<16x128xf32> to vector<2x128xf32>
    %cst_37 = arith.constant dense<0.000000e+00> : vector<2x128xf32>
    %142 = tpu.matmul %119, %8, %cst_37 {dimension_numbers = #tpu.dot_dimension_numbers<[1], [0], [0], [1], [0, 0, 1, 1], [], []>} : vector<2x32xf32>, vector<32x128xf32>, vector<2x128xf32> -> vector<2x128xf32>
    %143 = arith.addf %141, %142 : vector<2x128xf32>
    %144 = vector.extract_strided_slice %143 {offsets = [0, 0], sizes = [2, 96], strides = [1, 1]} : vector<2x128xf32> to vector<2x96xf32>
    %145 = arith.negf %144 : vector<2x96xf32>
    %146 = math.exp %145 : vector<2x96xf32>
    %cst_38 = arith.constant 1.000000e+00 : f32
    %147 = vector.broadcast %cst_38 : f32 to vector<2x96xf32>
    %148 = arith.addf %147, %146 : vector<2x96xf32>
    %149 = arith.divf %147, %148 : vector<2x96xf32>
    %150 = vector.extract_strided_slice %143 {offsets = [0, 96], sizes = [2, 32], strides = [1, 1]} : vector<2x128xf32> to vector<2x32xf32>
    %151 = math.tanh %150 : vector<2x32xf32>
    %152 = vector.extract_strided_slice %149 {offsets = [0, 32], sizes = [2, 32], strides = [1, 1]} : vector<2x96xf32> to vector<2x32xf32>
    %153 = arith.mulf %152, %116 : vector<2x32xf32>
    %154 = vector.extract_strided_slice %149 {offsets = [0, 0], sizes = [2, 32], strides = [1, 1]} : vector<2x96xf32> to vector<2x32xf32>
    %155 = arith.mulf %154, %151 : vector<2x32xf32>
    %156 = arith.addf %153, %155 : vector<2x32xf32>
    %157 = vector.extract_strided_slice %149 {offsets = [0, 64], sizes = [2, 32], strides = [1, 1]} : vector<2x96xf32> to vector<2x32xf32>
    %158 = math.tanh %156 : vector<2x32xf32>
    %159 = arith.mulf %157, %158 : vector<2x32xf32>
    %cst_39 = arith.constant dense<0.000000e+00> : vector<2x128xf32>
    %160 = tpu.matmul %159, %7, %cst_39 {dimension_numbers = #tpu.dot_dimension_numbers<[1], [0], [0], [1], [0, 0, 1, 1], [], []>} : vector<2x32xf32>, vector<32x128xf32>, vector<2x128xf32> -> vector<2x128xf32>
    %161 = vector.broadcast %11 : vector<1x128xf32> to vector<2x128xf32>
    %162 = arith.addf %160, %161 : vector<2x128xf32>
    %cst_40 = arith.constant dense<0.000000e+00> : vector<2x128xf32>
    %163 = tpu.matmul %140, %9, %cst_40 {dimension_numbers = #tpu.dot_dimension_numbers<[1], [0], [0], [1], [0, 0, 1, 1], [], []>} : vector<2x32xf32>, vector<32x128xf32>, vector<2x128xf32> -> vector<2x128xf32>
    %164 = arith.addf %162, %163 : vector<2x128xf32>
    %165 = vector.extract_strided_slice %164 {offsets = [0, 0], sizes = [2, 96], strides = [1, 1]} : vector<2x128xf32> to vector<2x96xf32>
    %166 = arith.negf %165 : vector<2x96xf32>
    %167 = math.exp %166 : vector<2x96xf32>
    %cst_41 = arith.constant 1.000000e+00 : f32
    %168 = vector.broadcast %cst_41 : f32 to vector<2x96xf32>
    %169 = arith.addf %168, %167 : vector<2x96xf32>
    %170 = arith.divf %168, %169 : vector<2x96xf32>
    %171 = vector.extract_strided_slice %164 {offsets = [0, 96], sizes = [2, 32], strides = [1, 1]} : vector<2x128xf32> to vector<2x32xf32>
    %172 = math.tanh %171 : vector<2x32xf32>
    %173 = vector.extract_strided_slice %170 {offsets = [0, 32], sizes = [2, 32], strides = [1, 1]} : vector<2x96xf32> to vector<2x32xf32>
    %174 = arith.mulf %173, %137 : vector<2x32xf32>
    %175 = vector.extract_strided_slice %170 {offsets = [0, 0], sizes = [2, 32], strides = [1, 1]} : vector<2x96xf32> to vector<2x32xf32>
    %176 = arith.mulf %175, %172 : vector<2x32xf32>
    %177 = arith.addf %174, %176 : vector<2x32xf32>
    %178 = vector.extract_strided_slice %170 {offsets = [0, 64], sizes = [2, 32], strides = [1, 1]} : vector<2x96xf32> to vector<2x32xf32>
    %179 = math.tanh %177 : vector<2x32xf32>
    %180 = arith.mulf %178, %179 : vector<2x32xf32>
    %181 = vector.extract_strided_slice %14 {offsets = [8, 0], sizes = [2, 128], strides = [1, 1]} : vector<16x128xf32> to vector<2x128xf32>
    %cst_42 = arith.constant dense<0.000000e+00> : vector<2x128xf32>
    %182 = tpu.matmul %159, %8, %cst_42 {dimension_numbers = #tpu.dot_dimension_numbers<[1], [0], [0], [1], [0, 0, 1, 1], [], []>} : vector<2x32xf32>, vector<32x128xf32>, vector<2x128xf32> -> vector<2x128xf32>
    %183 = arith.addf %181, %182 : vector<2x128xf32>
    %184 = vector.extract_strided_slice %183 {offsets = [0, 0], sizes = [2, 96], strides = [1, 1]} : vector<2x128xf32> to vector<2x96xf32>
    %185 = arith.negf %184 : vector<2x96xf32>
    %186 = math.exp %185 : vector<2x96xf32>
    %cst_43 = arith.constant 1.000000e+00 : f32
    %187 = vector.broadcast %cst_43 : f32 to vector<2x96xf32>
    %188 = arith.addf %187, %186 : vector<2x96xf32>
    %189 = arith.divf %187, %188 : vector<2x96xf32>
    %190 = vector.extract_strided_slice %183 {offsets = [0, 96], sizes = [2, 32], strides = [1, 1]} : vector<2x128xf32> to vector<2x32xf32>
    %191 = math.tanh %190 : vector<2x32xf32>
    %192 = vector.extract_strided_slice %189 {offsets = [0, 32], sizes = [2, 32], strides = [1, 1]} : vector<2x96xf32> to vector<2x32xf32>
    %193 = arith.mulf %192, %156 : vector<2x32xf32>
    %194 = vector.extract_strided_slice %189 {offsets = [0, 0], sizes = [2, 32], strides = [1, 1]} : vector<2x96xf32> to vector<2x32xf32>
    %195 = arith.mulf %194, %191 : vector<2x32xf32>
    %196 = arith.addf %193, %195 : vector<2x32xf32>
    %197 = vector.extract_strided_slice %189 {offsets = [0, 64], sizes = [2, 32], strides = [1, 1]} : vector<2x96xf32> to vector<2x32xf32>
    %198 = math.tanh %196 : vector<2x32xf32>
    %199 = arith.mulf %197, %198 : vector<2x32xf32>
    %cst_44 = arith.constant dense<0.000000e+00> : vector<2x128xf32>
    %200 = tpu.matmul %199, %7, %cst_44 {dimension_numbers = #tpu.dot_dimension_numbers<[1], [0], [0], [1], [0, 0, 1, 1], [], []>} : vector<2x32xf32>, vector<32x128xf32>, vector<2x128xf32> -> vector<2x128xf32>
    %201 = vector.broadcast %11 : vector<1x128xf32> to vector<2x128xf32>
    %202 = arith.addf %200, %201 : vector<2x128xf32>
    %cst_45 = arith.constant dense<0.000000e+00> : vector<2x128xf32>
    %203 = tpu.matmul %180, %9, %cst_45 {dimension_numbers = #tpu.dot_dimension_numbers<[1], [0], [0], [1], [0, 0, 1, 1], [], []>} : vector<2x32xf32>, vector<32x128xf32>, vector<2x128xf32> -> vector<2x128xf32>
    %204 = arith.addf %202, %203 : vector<2x128xf32>
    %205 = vector.extract_strided_slice %204 {offsets = [0, 0], sizes = [2, 96], strides = [1, 1]} : vector<2x128xf32> to vector<2x96xf32>
    %206 = arith.negf %205 : vector<2x96xf32>
    %207 = math.exp %206 : vector<2x96xf32>
    %cst_46 = arith.constant 1.000000e+00 : f32
    %208 = vector.broadcast %cst_46 : f32 to vector<2x96xf32>
    %209 = arith.addf %208, %207 : vector<2x96xf32>
    %210 = arith.divf %208, %209 : vector<2x96xf32>
    %211 = vector.extract_strided_slice %204 {offsets = [0, 96], sizes = [2, 32], strides = [1, 1]} : vector<2x128xf32> to vector<2x32xf32>
    %212 = math.tanh %211 : vector<2x32xf32>
    %213 = vector.extract_strided_slice %210 {offsets = [0, 32], sizes = [2, 32], strides = [1, 1]} : vector<2x96xf32> to vector<2x32xf32>
    %214 = arith.mulf %213, %177 : vector<2x32xf32>
    %215 = vector.extract_strided_slice %210 {offsets = [0, 0], sizes = [2, 32], strides = [1, 1]} : vector<2x96xf32> to vector<2x32xf32>
    %216 = arith.mulf %215, %212 : vector<2x32xf32>
    %217 = arith.addf %214, %216 : vector<2x32xf32>
    %218 = vector.extract_strided_slice %210 {offsets = [0, 64], sizes = [2, 32], strides = [1, 1]} : vector<2x96xf32> to vector<2x32xf32>
    %219 = math.tanh %217 : vector<2x32xf32>
    %220 = arith.mulf %218, %219 : vector<2x32xf32>
    %221 = vector.extract_strided_slice %14 {offsets = [10, 0], sizes = [2, 128], strides = [1, 1]} : vector<16x128xf32> to vector<2x128xf32>
    %cst_47 = arith.constant dense<0.000000e+00> : vector<2x128xf32>
    %222 = tpu.matmul %199, %8, %cst_47 {dimension_numbers = #tpu.dot_dimension_numbers<[1], [0], [0], [1], [0, 0, 1, 1], [], []>} : vector<2x32xf32>, vector<32x128xf32>, vector<2x128xf32> -> vector<2x128xf32>
    %223 = arith.addf %221, %222 : vector<2x128xf32>
    %224 = vector.extract_strided_slice %223 {offsets = [0, 0], sizes = [2, 96], strides = [1, 1]} : vector<2x128xf32> to vector<2x96xf32>
    %225 = arith.negf %224 : vector<2x96xf32>
    %226 = math.exp %225 : vector<2x96xf32>
    %cst_48 = arith.constant 1.000000e+00 : f32
    %227 = vector.broadcast %cst_48 : f32 to vector<2x96xf32>
    %228 = arith.addf %227, %226 : vector<2x96xf32>
    %229 = arith.divf %227, %228 : vector<2x96xf32>
    %230 = vector.extract_strided_slice %223 {offsets = [0, 96], sizes = [2, 32], strides = [1, 1]} : vector<2x128xf32> to vector<2x32xf32>
    %231 = math.tanh %230 : vector<2x32xf32>
    %232 = vector.extract_strided_slice %229 {offsets = [0, 32], sizes = [2, 32], strides = [1, 1]} : vector<2x96xf32> to vector<2x32xf32>
    %233 = arith.mulf %232, %196 : vector<2x32xf32>
    %234 = vector.extract_strided_slice %229 {offsets = [0, 0], sizes = [2, 32], strides = [1, 1]} : vector<2x96xf32> to vector<2x32xf32>
    %235 = arith.mulf %234, %231 : vector<2x32xf32>
    %236 = arith.addf %233, %235 : vector<2x32xf32>
    %237 = vector.extract_strided_slice %229 {offsets = [0, 64], sizes = [2, 32], strides = [1, 1]} : vector<2x96xf32> to vector<2x32xf32>
    %238 = math.tanh %236 : vector<2x32xf32>
    %239 = arith.mulf %237, %238 : vector<2x32xf32>
    %cst_49 = arith.constant dense<0.000000e+00> : vector<2x128xf32>
    %240 = tpu.matmul %239, %7, %cst_49 {dimension_numbers = #tpu.dot_dimension_numbers<[1], [0], [0], [1], [0, 0, 1, 1], [], []>} : vector<2x32xf32>, vector<32x128xf32>, vector<2x128xf32> -> vector<2x128xf32>
    %241 = vector.broadcast %11 : vector<1x128xf32> to vector<2x128xf32>
    %242 = arith.addf %240, %241 : vector<2x128xf32>
    %cst_50 = arith.constant dense<0.000000e+00> : vector<2x128xf32>
    %243 = tpu.matmul %220, %9, %cst_50 {dimension_numbers = #tpu.dot_dimension_numbers<[1], [0], [0], [1], [0, 0, 1, 1], [], []>} : vector<2x32xf32>, vector<32x128xf32>, vector<2x128xf32> -> vector<2x128xf32>
    %244 = arith.addf %242, %243 : vector<2x128xf32>
    %245 = vector.extract_strided_slice %244 {offsets = [0, 0], sizes = [2, 96], strides = [1, 1]} : vector<2x128xf32> to vector<2x96xf32>
    %246 = arith.negf %245 : vector<2x96xf32>
    %247 = math.exp %246 : vector<2x96xf32>
    %cst_51 = arith.constant 1.000000e+00 : f32
    %248 = vector.broadcast %cst_51 : f32 to vector<2x96xf32>
    %249 = arith.addf %248, %247 : vector<2x96xf32>
    %250 = arith.divf %248, %249 : vector<2x96xf32>
    %251 = vector.extract_strided_slice %244 {offsets = [0, 96], sizes = [2, 32], strides = [1, 1]} : vector<2x128xf32> to vector<2x32xf32>
    %252 = math.tanh %251 : vector<2x32xf32>
    %253 = vector.extract_strided_slice %250 {offsets = [0, 32], sizes = [2, 32], strides = [1, 1]} : vector<2x96xf32> to vector<2x32xf32>
    %254 = arith.mulf %253, %217 : vector<2x32xf32>
    %255 = vector.extract_strided_slice %250 {offsets = [0, 0], sizes = [2, 32], strides = [1, 1]} : vector<2x96xf32> to vector<2x32xf32>
    %256 = arith.mulf %255, %252 : vector<2x32xf32>
    %257 = arith.addf %254, %256 : vector<2x32xf32>
    %258 = vector.extract_strided_slice %250 {offsets = [0, 64], sizes = [2, 32], strides = [1, 1]} : vector<2x96xf32> to vector<2x32xf32>
    %259 = math.tanh %257 : vector<2x32xf32>
    %260 = arith.mulf %258, %259 : vector<2x32xf32>
    %261 = vector.extract_strided_slice %14 {offsets = [12, 0], sizes = [2, 128], strides = [1, 1]} : vector<16x128xf32> to vector<2x128xf32>
    %cst_52 = arith.constant dense<0.000000e+00> : vector<2x128xf32>
    %262 = tpu.matmul %239, %8, %cst_52 {dimension_numbers = #tpu.dot_dimension_numbers<[1], [0], [0], [1], [0, 0, 1, 1], [], []>} : vector<2x32xf32>, vector<32x128xf32>, vector<2x128xf32> -> vector<2x128xf32>
    %263 = arith.addf %261, %262 : vector<2x128xf32>
    %264 = vector.extract_strided_slice %263 {offsets = [0, 0], sizes = [2, 96], strides = [1, 1]} : vector<2x128xf32> to vector<2x96xf32>
    %265 = arith.negf %264 : vector<2x96xf32>
    %266 = math.exp %265 : vector<2x96xf32>
    %cst_53 = arith.constant 1.000000e+00 : f32
    %267 = vector.broadcast %cst_53 : f32 to vector<2x96xf32>
    %268 = arith.addf %267, %266 : vector<2x96xf32>
    %269 = arith.divf %267, %268 : vector<2x96xf32>
    %270 = vector.extract_strided_slice %263 {offsets = [0, 96], sizes = [2, 32], strides = [1, 1]} : vector<2x128xf32> to vector<2x32xf32>
    %271 = math.tanh %270 : vector<2x32xf32>
    %272 = vector.extract_strided_slice %269 {offsets = [0, 32], sizes = [2, 32], strides = [1, 1]} : vector<2x96xf32> to vector<2x32xf32>
    %273 = arith.mulf %272, %236 : vector<2x32xf32>
    %274 = vector.extract_strided_slice %269 {offsets = [0, 0], sizes = [2, 32], strides = [1, 1]} : vector<2x96xf32> to vector<2x32xf32>
    %275 = arith.mulf %274, %271 : vector<2x32xf32>
    %276 = arith.addf %273, %275 : vector<2x32xf32>
    %277 = vector.extract_strided_slice %269 {offsets = [0, 64], sizes = [2, 32], strides = [1, 1]} : vector<2x96xf32> to vector<2x32xf32>
    %278 = math.tanh %276 : vector<2x32xf32>
    %279 = arith.mulf %277, %278 : vector<2x32xf32>
    %cst_54 = arith.constant dense<0.000000e+00> : vector<2x128xf32>
    %280 = tpu.matmul %279, %7, %cst_54 {dimension_numbers = #tpu.dot_dimension_numbers<[1], [0], [0], [1], [0, 0, 1, 1], [], []>} : vector<2x32xf32>, vector<32x128xf32>, vector<2x128xf32> -> vector<2x128xf32>
    %281 = vector.broadcast %11 : vector<1x128xf32> to vector<2x128xf32>
    %282 = arith.addf %280, %281 : vector<2x128xf32>
    %cst_55 = arith.constant dense<0.000000e+00> : vector<2x128xf32>
    %283 = tpu.matmul %260, %9, %cst_55 {dimension_numbers = #tpu.dot_dimension_numbers<[1], [0], [0], [1], [0, 0, 1, 1], [], []>} : vector<2x32xf32>, vector<32x128xf32>, vector<2x128xf32> -> vector<2x128xf32>
    %284 = arith.addf %282, %283 : vector<2x128xf32>
    %285 = vector.extract_strided_slice %284 {offsets = [0, 0], sizes = [2, 96], strides = [1, 1]} : vector<2x128xf32> to vector<2x96xf32>
    %286 = arith.negf %285 : vector<2x96xf32>
    %287 = math.exp %286 : vector<2x96xf32>
    %cst_56 = arith.constant 1.000000e+00 : f32
    %288 = vector.broadcast %cst_56 : f32 to vector<2x96xf32>
    %289 = arith.addf %288, %287 : vector<2x96xf32>
    %290 = arith.divf %288, %289 : vector<2x96xf32>
    %291 = vector.extract_strided_slice %284 {offsets = [0, 96], sizes = [2, 32], strides = [1, 1]} : vector<2x128xf32> to vector<2x32xf32>
    %292 = math.tanh %291 : vector<2x32xf32>
    %293 = vector.extract_strided_slice %290 {offsets = [0, 32], sizes = [2, 32], strides = [1, 1]} : vector<2x96xf32> to vector<2x32xf32>
    %294 = arith.mulf %293, %257 : vector<2x32xf32>
    %295 = vector.extract_strided_slice %290 {offsets = [0, 0], sizes = [2, 32], strides = [1, 1]} : vector<2x96xf32> to vector<2x32xf32>
    %296 = arith.mulf %295, %292 : vector<2x32xf32>
    %297 = arith.addf %294, %296 : vector<2x32xf32>
    %298 = vector.extract_strided_slice %290 {offsets = [0, 64], sizes = [2, 32], strides = [1, 1]} : vector<2x96xf32> to vector<2x32xf32>
    %299 = math.tanh %297 : vector<2x32xf32>
    %300 = arith.mulf %298, %299 : vector<2x32xf32>
    %301 = vector.extract_strided_slice %14 {offsets = [14, 0], sizes = [2, 128], strides = [1, 1]} : vector<16x128xf32> to vector<2x128xf32>
    %cst_57 = arith.constant dense<0.000000e+00> : vector<2x128xf32>
    %302 = tpu.matmul %279, %8, %cst_57 {dimension_numbers = #tpu.dot_dimension_numbers<[1], [0], [0], [1], [0, 0, 1, 1], [], []>} : vector<2x32xf32>, vector<32x128xf32>, vector<2x128xf32> -> vector<2x128xf32>
    %303 = arith.addf %301, %302 : vector<2x128xf32>
    %304 = vector.extract_strided_slice %303 {offsets = [0, 0], sizes = [2, 96], strides = [1, 1]} : vector<2x128xf32> to vector<2x96xf32>
    %305 = arith.negf %304 : vector<2x96xf32>
    %306 = math.exp %305 : vector<2x96xf32>
    %cst_58 = arith.constant 1.000000e+00 : f32
    %307 = vector.broadcast %cst_58 : f32 to vector<2x96xf32>
    %308 = arith.addf %307, %306 : vector<2x96xf32>
    %309 = arith.divf %307, %308 : vector<2x96xf32>
    %310 = vector.extract_strided_slice %303 {offsets = [0, 96], sizes = [2, 32], strides = [1, 1]} : vector<2x128xf32> to vector<2x32xf32>
    %311 = math.tanh %310 : vector<2x32xf32>
    %312 = vector.extract_strided_slice %309 {offsets = [0, 32], sizes = [2, 32], strides = [1, 1]} : vector<2x96xf32> to vector<2x32xf32>
    %313 = arith.mulf %312, %276 : vector<2x32xf32>
    %314 = vector.extract_strided_slice %309 {offsets = [0, 0], sizes = [2, 32], strides = [1, 1]} : vector<2x96xf32> to vector<2x32xf32>
    %315 = arith.mulf %314, %311 : vector<2x32xf32>
    %316 = arith.addf %313, %315 : vector<2x32xf32>
    %317 = vector.extract_strided_slice %309 {offsets = [0, 64], sizes = [2, 32], strides = [1, 1]} : vector<2x96xf32> to vector<2x32xf32>
    %318 = math.tanh %316 : vector<2x32xf32>
    %319 = arith.mulf %317, %318 : vector<2x32xf32>
    %cst_59 = arith.constant dense<0.000000e+00> : vector<2x128xf32>
    %320 = tpu.matmul %319, %7, %cst_59 {dimension_numbers = #tpu.dot_dimension_numbers<[1], [0], [0], [1], [0, 0, 1, 1], [], []>} : vector<2x32xf32>, vector<32x128xf32>, vector<2x128xf32> -> vector<2x128xf32>
    %321 = vector.broadcast %11 : vector<1x128xf32> to vector<2x128xf32>
    %322 = arith.addf %320, %321 : vector<2x128xf32>
    %cst_60 = arith.constant dense<0.000000e+00> : vector<2x128xf32>
    %323 = tpu.matmul %300, %9, %cst_60 {dimension_numbers = #tpu.dot_dimension_numbers<[1], [0], [0], [1], [0, 0, 1, 1], [], []>} : vector<2x32xf32>, vector<32x128xf32>, vector<2x128xf32> -> vector<2x128xf32>
    %324 = arith.addf %322, %323 : vector<2x128xf32>
    %325 = vector.extract_strided_slice %324 {offsets = [0, 0], sizes = [2, 96], strides = [1, 1]} : vector<2x128xf32> to vector<2x96xf32>
    %326 = arith.negf %325 : vector<2x96xf32>
    %327 = math.exp %326 : vector<2x96xf32>
    %cst_61 = arith.constant 1.000000e+00 : f32
    %328 = vector.broadcast %cst_61 : f32 to vector<2x96xf32>
    %329 = arith.addf %328, %327 : vector<2x96xf32>
    %330 = arith.divf %328, %329 : vector<2x96xf32>
    %331 = vector.extract_strided_slice %324 {offsets = [0, 96], sizes = [2, 32], strides = [1, 1]} : vector<2x128xf32> to vector<2x32xf32>
    %332 = math.tanh %331 : vector<2x32xf32>
    %333 = vector.extract_strided_slice %330 {offsets = [0, 32], sizes = [2, 32], strides = [1, 1]} : vector<2x96xf32> to vector<2x32xf32>
    %334 = arith.mulf %333, %297 : vector<2x32xf32>
    %335 = vector.extract_strided_slice %330 {offsets = [0, 0], sizes = [2, 32], strides = [1, 1]} : vector<2x96xf32> to vector<2x32xf32>
    %336 = arith.mulf %335, %332 : vector<2x32xf32>
    %337 = arith.addf %334, %336 : vector<2x32xf32>
    %338 = vector.extract_strided_slice %330 {offsets = [0, 64], sizes = [2, 32], strides = [1, 1]} : vector<2x96xf32> to vector<2x32xf32>
    %339 = math.tanh %337 : vector<2x32xf32>
    %340 = arith.mulf %338, %339 : vector<2x32xf32>
    %c0_62 = arith.constant 0 : index
    %c0_63 = arith.constant 0 : index
    %341 = vector.load %arg11[%c0_62, %c0_63] : memref<32x4xf32, #tpu.memory_space<vmem>>, vector<32x4xf32>
    %cst_64 = arith.constant dense<0.000000e+00> : vector<2x4xf32>
    %342 = tpu.matmul %340, %341, %cst_64 {dimension_numbers = #tpu.dot_dimension_numbers<[1], [0], [0], [1], [0, 0, 1, 1], [], []>} : vector<2x32xf32>, vector<32x4xf32>, vector<2x4xf32> -> vector<2x4xf32>
    %c0_65 = arith.constant 0 : index
    %c0_66 = arith.constant 0 : index
    %343 = vector.load %arg12[%c0_65, %c0_66] : memref<1x4xf32, #tpu.memory_space<vmem>>, vector<1x4xf32>
    %344 = vector.broadcast %343 : vector<1x4xf32> to vector<2x4xf32>
    %345 = arith.addf %342, %344 : vector<2x4xf32>
    %c0_67 = arith.constant 0 : index
    %c0_68 = arith.constant 0 : index
    %346 = vector.load %arg13[%c0_67, %c0_68] : memref<2x4xf32, #tpu.memory_space<vmem>>, vector<2x4xf32>
    tpu.vector_store %arg13[%c0_67, %c0_68], %345 {strides = array<i32>} : memref<2x4xf32, #tpu.memory_space<vmem>>, vector<2x4xf32>,
    %347 = tpu.concatenate %319, %340, %316, %337 in 1 : vector<2x32xf32>, vector<2x32xf32>, vector<2x32xf32>, vector<2x32xf32> -> vector<2x128xf32>
    %c0_69 = arith.constant 0 : index
    %c0_70 = arith.constant 0 : index
    %348 = vector.load %arg14[%c0_69, %c0_70] : memref<2x128xf32, #tpu.memory_space<vmem>>, vector<2x128xf32>
    tpu.vector_store %arg14[%c0_69, %c0_70], %347 {strides = array<i32>} : memref<2x128xf32, #tpu.memory_space<vmem>>, vector<2x128xf32>,
    return
  }
}

</mosaic_0001>

<bundles_post_ra>
// kernel: tpu_custom_call.1
= control target key start
LH: loop header
LB: loop body
LE: loop exit
PB: predicated region body
PF: predicated region fallthrough
CT: control target
= control target key end

     0   :  { %20 = vsyncpa [#allocation3], 0  ;;  %s4075_s0 = inlined_call_operand.hbm [shape: f32[16,16], index: 0, kind: input, shape index: {}]   ;;  %s4076_s1 = inlined_call_operand.vmem [shape: f32[2,64], index: 1, kind: input, shape index: {}]   ;;  %s4077_s2 = inlined_call_operand.vmem [shape: f32[2,64], index: 2, kind: input, shape index: {}]   ;;  %s4078_s3 = inlined_call_operand.hbm [shape: f32[16,32], index: 3, kind: input, shape index: {}]   ;;  %s4079_s4 = inlined_call_operand.vmem [shape: f32[1,32], index: 4, kind: input, shape index: {}]   ;;  %s4080_s5 = inlined_call_operand.vmem [shape: f32[32,128], index: 5, kind: input, shape index: {}]   ;;  %s4081_s6 = inlined_call_operand.hbm [shape: f32[32,128], index: 6, kind: input, shape index: {}]   ;;  %s4082_s7 = inlined_call_operand.vmem [shape: f32[1,128], index: 7, kind: input, shape index: {}]   ;;  %s4083_s8 = inlined_call_operand.hbm [shape: f32[32,128], index: 8, kind: input, shape index: {}]   ;;  %s4084_s9 = inlined_call_operand.hbm [shape: f32[32,128], index: 9, kind: input, shape index: {}]   ;;  %s4085_s10 = inlined_call_operand.vmem [shape: f32[1,128], index: 10, kind: input, shape index: {}]   ;;  %s4086_s11 = inlined_call_operand.vmem [shape: f32[32,4], index: 11, kind: input, shape index: {}]   ;;  %s4087_s12 = inlined_call_operand.vmem [shape: f32[1,4], index: 12, kind: input, shape index: {}]   ;;  %s4088_s13 = inlined_call_operand.hbm [shape: f32[2,4], index: 13, kind: output, shape index: {0}]   ;;  %s4089_s14 = inlined_call_operand.hbm [shape: f32[2,128], index: 14, kind: output, shape index: {1}]  }
   0x1   :  { %21 = vsyncpa [#allocation6], 0 }
   0x2   :  { %22 = vsyncpa [#allocation9], 0 }
   0x3   :  { %23 = vsyncpa [#allocation4], 0 }
   0x4   :  { %24 = vsyncpa [#allocation13], 0  ;;  %s3457_s29 = smov [#allocation5]   ;;  %s3458_s15 = smov [#allocation8]  }
   0x5   :  { %s46_s30 = sshll.u32 %s3457_s29, 4  ;;  %s76_s16 = sshll.u32 %s3458_s15, 4  ;;  %s47_s30 = int_to_ptr.vmem [resolvable:$true] %s46_s30  ;;  %s77_s16 = int_to_ptr.vmem [resolvable:$true] %s76_s16 }
   0x6   :  { %s3315_s17 = scalar_lea.vmem %s47_s30, 256  ;;  %p3320_p1 = scmp.lt.s32.totalorder %s47_s30, %s47_s30 }
   0x7   :  { %p3316_p0 = scmp.ne.s32.totalorder %s47_s30, %s3315_s17  ;;  %p3321_p2 = scmp.lt.s32.totalorder %s3315_s17, %s3315_s17 }
   0x9   :  { %p3322_p3 = por %p3321_p2, %p3320_p1 }
   0xb   :  { %p3323_p4 = pnand %p3322_p3, %p3316_p0 }
   0xd   :  { %3326 = shalt.err (!%p3323_p4)
}
   0xe   :  { %s3459_s18 = smov 128   ;;  %s3460_s19 = smov 8  }
   0xf   :  { %52 = dma.hbm_to_vmem [thread:$0]  %s4078_s3, 256, %s47_s30, [#allocation6], %s3459_s18, %s3459_s18, %s3460_s19  }
  0x10   :  { %s3335_s22 = scalar_lea.vmem %s77_s16, 512  ;;  %p3340_p6 = scmp.lt.s32.totalorder %s77_s16, %s77_s16 }
  0x11   :  { %p3336_p5 = scmp.ne.s32.totalorder %s77_s16, %s3335_s22  ;;  %p3341_p7 = scmp.lt.s32.totalorder %s3335_s22, %s3335_s22 }
  0x13   :  { %p3342_p8 = por %p3341_p7, %p3340_p6 }
  0x15   :  { %p3343_p9 = pnand %p3342_p8, %p3336_p5 }
  0x17   :  { %3346 = shalt.err (!%p3343_p9)
}
  0x18   :  { %82 = dma.hbm_to_vmem [thread:$0]  %s4083_s8, 512, %s77_s16, [#allocation9], %s3459_s18, %s3459_s18, %s3460_s19  }
  0x19   :  { %s3461_s25 = smov [#allocation2]   ;;  %s3462_s27 = smov [#allocation7]  }
  0x1a   :  { %s30_s26 = sshll.u32 %s3461_s25, 4  ;;  %s62_s28 = sshll.u32 %s3462_s27, 4  ;;  %s31_s26 = int_to_ptr.vmem [resolvable:$true] %s30_s26  ;;  %s63_s28 = int_to_ptr.vmem [resolvable:$true] %s62_s28 }
  0x1b   :  { %s3355_s3 = scalar_lea.vmem %s31_s26, 256  ;;  %p3360_p11 = scmp.lt.s32.totalorder %s31_s26, %s31_s26 }
  0x1c   :  { %p3356_p10 = scmp.ne.s32.totalorder %s31_s26, %s3355_s3  ;;  %p3361_p12 = scmp.lt.s32.totalorder %s3355_s3, %s3355_s3 }
  0x1e   :  { %p3362_p13 = por %p3361_p12, %p3360_p11 }
  0x20   :  { %p3363_p0 = pnand %p3362_p13, %p3356_p10 }
  0x22   :  { %3366 = shalt.err (!%p3363_p0)
}
  0x23   :  { %36 = dma.hbm_to_vmem [thread:$0]  %s4075_s0, 256, %s31_s26, [#allocation3], %s3459_s18, %s3459_s18, %s3460_s19  }
  0x24   :  { %s3375_s8 = scalar_lea.vmem %s63_s28, 512  ;;  %p3380_p2 = scmp.lt.s32.totalorder %s63_s28, %s63_s28 }
  0x25   :  { %p3376_p1 = scmp.ne.s32.totalorder %s63_s28, %s3375_s8  ;;  %p3381_p3 = scmp.lt.s32.totalorder %s3375_s8, %s3375_s8 }
  0x27   :  { %p3382_p4 = por %p3381_p3, %p3380_p2 }
  0x29   :  { %p3383_p5 = pnand %p3382_p4, %p3376_p1 }
  0x2b   :  { %3386 = shalt.err (!%p3383_p5)
}
  0x2c   :  { %68 = dma.hbm_to_vmem [thread:$0]  %s4081_s6, 512, %s63_s28, [#allocation6], %s3459_s18, %s3459_s18, %s3460_s19  }
  0x2d   :  { %s3463_s17 = smov [#allocation10]  }
  0x2e   :  { %s88_s20 = sshll.u32 %s3463_s17, 4  ;;  %s89_s20 = int_to_ptr.vmem [resolvable:$true] %s88_s20 }
  0x2f   :  { %s3395_s21 = scalar_lea.vmem %s89_s20, 512  ;;  %p3400_p7 = scmp.lt.s32.totalorder %s89_s20, %s89_s20 }
  0x30   :  { %p3396_p6 = scmp.ne.s32.totalorder %s89_s20, %s3395_s21  ;;  %p3401_p8 = scmp.lt.s32.totalorder %s3395_s21, %s3395_s21 }
  0x32   :  { %p3402_p9 = por %p3401_p8, %p3400_p7 }
  0x34   :  { %p3403_p10 = pnand %p3402_p9, %p3396_p6 }
  0x36   :  { %3406 = shalt.err (!%p3403_p10)
}
  0x37   :  { %94 = dma.hbm_to_vmem [thread:$0]  %s4084_s9, 512, %s89_s20, [#allocation9], %s3459_s18, %s3459_s18, %s3460_s19  }
  0x38   :  { %3447 = dma.done.wait [#allocation3], 256  }
  0x39   :  { %3448 = vsyncadd [#allocation3], 4294967040 }
  0x3a   :  { %3449 = dma.done.wait [#allocation6], 768  }
  0x3b   :  { %3450 = vsyncadd [#allocation6], 4294966528 }
  0x3c   :  { %3451 = dma.done.wait [#allocation9], 1024  }
  0x3d   :  { %3452 = vsyncadd [#allocation9], 4294966272  ;;  %vm127_vm0 = vcmask 130048   ;;  %v119_v0 = vld [vmem:[#allocation5 + $0x8] sm:$0xff]  ;;  %v118_v1 = vld [vmem:[#allocation5] sm:$0xff]  ;;  %v3464_v6 = vmov 0.0  }
  0x3e   :  { %v116_v2 = vld [vmem:[#allocation2] sm:$0xff]  ;;  %2859 = vmatprep.subr.mxu0 %v119_v0  ;;  %v212_v3 = vld [vmem:[%s4080_s5 + $0x18] sm:$0xff]  ;;  %v117_v4 = vld [vmem:[#allocation2 + $0x8] sm:$0xff]  ;;  %vm233_vm1 = vcmask 261120   ;;  %vm3465_vm2 = vmmov 0   ;;  %vm2639_vm3 = vcmask 523264  }
  0x3f   :  { %2863 = vmatprep.mubr.msk.f32.mxu0 %vm127_vm0, %v116_v2  ;;  %2860 = vmatpush3.msra.mxu0 %v119_v0  ;;  %v211_v5 = vld [vmem:[%s4080_s5 + $0x10] sm:$0xff]  ;;  %v3583_v7 = vld [vmem:[#allocation7 + $0x18] sm:$0xff]  ;;  %v210_v8 = vld [vmem:[%s4080_s5 + $0x8] sm:$0xff]  ;;  %vm2641_vm4 = vcmask 785408  }
  0x40   :  { %2866 = vmatprep.subr.mxu1 %v212_v3  ;;  %2861 = vmatprep.subr.mxu0 %v118_v1  ;;  %v3590_v9 = vld [vmem:[#allocation7 + $0x10] sm:$0xff]  ;;  %v209_v10 = vld [vmem:[%s4080_s5] sm:$0xff]  ;;  %v3597_v11 = vld [vmem:[#allocation7 + $0x8] sm:$0xff] }
  0x41   :  { %2867 = vmatpush3.msra.mxu1 %v212_v3  ;;  %2862 = vmatpush3.msra.mxu0 %v118_v1  ;;  %v3601_v12 = vld [vmem:[#allocation7] sm:$0xff]  ;;  %v3644_v39 = vld [vmem:[#allocation8 + $0x18] sm:$0xff]  ;;  %v3646_v40 = vld [vmem:[#allocation8 + $0x10] sm:$0xff] }
  0x42   :  { %2864 = vmatmul.mubr.msk.f32.vlgmr.msra.gmra.mxu0 %vm127_vm0, %v117_v4  ;;  %2868 = vmatprep.subr.mxu1 %v211_v5  ;;  %v3606_v13 = vld [vmem:[%s4076_s1] sm:$0x3]  ;;  %v3648_v41 = vld [vmem:[#allocation10 + $0x18] sm:$0xff]  ;;  %v3652_v42 = vld [vmem:[#allocation10 + $0x10] sm:$0xff] }
  0x43   :  { %2877 = vmatprep.subr.mxu0 %v3464_v6  ;;  %2869 = vmatpush3.msra.mxu1 %v211_v5  ;;  %v2675_v15 = vld [vmem:[%s4079_s4] ss:$0 sm:$0xff]  ;;  %s3466_s4 = smov 32   ;;  %v3655_v43 = vld [vmem:[#allocation8 + $0x8] sm:$0xff] }
  0x44   :  { %2878 = vmatpush3.msra.mxu0 %v3583_v7  ;;  %2870 = vmatprep.subr.mxu1 %v210_v8  ;;  %v2678_v21 = vld [vmem:[%s4082_s7] ss:$0 sm:$0xff]  ;;  %v3658_v44 = vld [vmem:[#allocation10 + $0x8] sm:$0xff]  ;;  %s3468_s7 = smov 64  }
  0x45   :  { %2879 = vmatprep.subr.mxu0 %v3464_v6  ;;  %2871 = vmatpush3.msra.mxu1 %v210_v8  ;;  %v3636_v28 = vld [vmem:[%s4077_s2] sm:$0x3]  ;;  %s3467_s2 = smov 96  }
  0x46   :  { %2880 = vmatpush3.msra.mxu0 %v3590_v9  ;;  %2872 = vmatprep.subr.mxu1 %v209_v10  ;;  %v3663_v45 = vld [vmem:[#allocation8] sm:$0xff] }
  0x47   :  { %2881 = vmatprep.subr.mxu0 %v3464_v6  ;;  %2873 = vmatpush3.msra.mxu1 %v209_v10  ;;  %v3675_v47 = vld [vmem:[#allocation10] sm:$0xff] }
  0x48   :  { %2882 = vmatpush3.msra.mxu0 %v3597_v11  ;;  %2888 = vmatprep.subr.mxu1 %v3464_v6  ;;  %v3716_v56 = vld [vmem:[%s4085_s10] ss:$0 sm:$0xff] }
  0x49   :  { %2883 = vmatprep.subr.mxu0 %v3464_v6  ;;  %2885 = vmatprep.mubr.msk.f32.mxu0 %vm3465_vm2, %v3464_v6 }
  0x4a   :  { %2884 = vmatpush3.msra.mxu0 %v3601_v12 }
  0x4b   :  { %2886 = vmatmul.mubr.msk.f32.vlgmr.msra.gmra.mxu0 %vm233_vm1, %v3606_v13  ;;  %2899 = vmatprep.subr.mxu0 %v3464_v6 }
  0x4c   :  { %2907 = vmatprep.mubr.msk.f32.mxu0 %vm3465_vm2, %v3464_v6  ;;  %2900 = vmatpush3.msra.mxu0 %v3648_v41 }
  0x4d   :  { %2901 = vmatprep.subr.mxu0 %v3464_v6 }
  0x4e   :  { %2902 = vmatpush3.msra.mxu0 %v3652_v42 }
  0x4f   :  { %2903 = vmatprep.subr.mxu0 %v3464_v6 }
  0x50   :  { %2904 = vmatpush3.msra.mxu0 %v3658_v44 }
  0x51   :  { %2905 = vmatprep.subr.mxu0 %v3464_v6 }
  0x52   :  { %2906 = vmatpush3.msra.mxu0 %v3675_v47 }
  0x53   :  { %2921 = vmatprep.subr.mxu0 %v3464_v6 }
 0x102   :  { %v2865_v14 = vpop.f32.mrf.mxu0 }
 0x103   :  { %v206_v18 = vadd.f32 %v2865_v14, %v2675_v15 }
 0x104   :  { %v200_v16 = vpop.f32.mrf.mxu0 }
 0x105   :  { %v201_v17 = vadd.f32 %v2675_v15, %v200_v16 }
 0x107   :  { %2874 = vmatprep.mubr.msk.f32.mxu1 %vm233_vm1, %v201_v17 }
 0x108   :  { %2875 = vmatmul.mubr.msk.f32.vlgmr.msra.gmra.mxu1 %vm233_vm1, %v206_v18 }
 0x109   :  { %2896 = vmatprep.mubr.msk.f32.mxu1 %vm3465_vm2, %v3464_v6  ;;  %2889 = vmatpush3.msra.mxu1 %v3644_v39 }
 0x10a   :  { %2890 = vmatprep.subr.mxu1 %v3464_v6 }
 0x10b   :  { %v386_v19 = vpop.f32.mrf.mxu0  ;;  %2891 = vmatpush3.msra.mxu1 %v3646_v40 }
 0x10c   :  { %2892 = vmatprep.subr.mxu1 %v3464_v6 }
 0x10d   :  { %v2887_v20 = vpop.f32.mrf.mxu0  ;;  %2893 = vmatpush3.msra.mxu1 %v3655_v43 }
 0x10e   :  { %2894 = vmatprep.subr.mxu1 %v3464_v6 }
 0x10f   :  { %2895 = vmatpush3.msra.mxu1 %v3663_v45 }
 0x110   :  { %2910 = vmatprep.subr.mxu1 %v3464_v6 }
 0x1c8   :  { %v2876_v22 = vpop.f32.mrf.mxu1 }
 0x1c9   :  { %v3627_v23 = vadd.f32 %v2876_v22, %v2678_v21 }
 0x1ca   :  { %v306_v24 = vpop.f32.mrf.mxu1 }
 0x1cb   :  { %v3629_v25 = vadd.f32 %v2678_v21, %v306_v24 }
 0x1cd   :  { %v390_v26 = vadd.f32 %v386_v19, %v3629_v25 }
 0x1cf   :  { %3166 = vtanh.f32 %v390_v26  ;;  %v2682_v29 = vmul.f32 -1.442695, %v390_v26 }
 0x1d1   :  { %3168 = vpow2.f32 %v2682_v29 }
 0x1dc   :  { %v3167_v27 = vpop.eup %3166 }
 0x1dd   :  { %404 = vrot.lane.b32.xlu0 %v3167_v27, %s3466_s4 }
 0x1de   :  { %v3169_v30 = vpop.eup %3168 }
 0x1df   :  { %v394_v31 = vadd.f32 1.0, %v3169_v30 }
 0x1e1   :  { %399 = vrot.lane.b32.xlu0 %v3636_v28, %s3466_s4  ;;  %3170 = vrcp.f32 %v394_v31 }
 0x1ee   :  { %v3171_v32 = vpop.eup %3170 }
 0x24f   :  { %v405_v33 = vpop.permute.xlu0 %404 }
 0x250   :  { %v407_v34 = vmul.f32 %v3171_v32, %v405_v33 }
 0x252   :  { %409 = vrot.lane.b32.xlu1 %v407_v34, %s3466_s4 }
 0x253   :  { %v400_v35 = vpop.permute.xlu0 %399 }
 0x254   :  { %v402_v36 = vmul.f32 %v3171_v32, %v400_v35 }
 0x2c4   :  { %v410_v37 = vpop.permute.xlu1 %409 }
 0x2c5   :  { %v3641_v38 = vadd.f32 %v410_v37, %v402_v36 }
 0x2c7   :  { %3172 = vtanh.f32 %v3641_v38  ;;  %v681_v18 = vrot.slane %v3641_v38, 6 }
 0x2d4   :  { %v3173_v46 = vpop.eup %3172 }
 0x2d5   :  { %415 = vrot.lane.b32.xlu1 %v3173_v46, %s3466_s4 }
 0x2d9   :  { %500 = vrot.lane.b32.xlu1 %v3606_v13, %s3467_s2 }
 0x347   :  { %v416_v48 = vpop.permute.xlu1 %415 }
 0x348   :  { %v418_v49 = vmul.f32 %v3171_v32, %v416_v48 }
 0x34a   :  { %426 = vrot.lane.b32.xlu0 %v418_v49, %s3468_s7 }
 0x34b   :  { %v501_v50 = vpop.permute.xlu1 %500 }
 0x34c   :  { %2908 = vmatmul.mubr.msk.f32.vlgmr.msra.gmra.mxu0 %vm233_vm1, %v501_v50 }
 0x34d   :  { %2922 = vmatpush3.msra.mxu0 %v3644_v39  ;;  %2929 = vmatprep.mubr.msk.f32.mxu0 %vm3465_vm2, %v3464_v6 }
 0x34e   :  { %2923 = vmatprep.subr.mxu0 %v3464_v6 }
 0x34f   :  { %2924 = vmatpush3.msra.mxu0 %v3646_v40 }
 0x350   :  { %2925 = vmatprep.subr.mxu0 %v3464_v6 }
 0x351   :  { %2926 = vmatpush3.msra.mxu0 %v3655_v43 }
 0x352   :  { %2927 = vmatprep.subr.mxu0 %v3464_v6 }
 0x353   :  { %2928 = vmatpush3.msra.mxu0 %v3663_v45 }
 0x354   :  { %2943 = vmatprep.subr.mxu0 %v3464_v6 }
 0x3bc   :  { %v427_v51 = vpop.permute.xlu0 %426 }
 0x3bd   :  { %2897 = vmatmul.mubr.msk.f32.vlgmr.msra.gmra.mxu1 %vm233_vm1, %v427_v51 }
 0x3be   :  { %2911 = vmatpush3.msra.mxu1 %v3583_v7  ;;  %2918 = vmatprep.mubr.msk.f32.mxu1 %vm3465_vm2, %v3464_v6 }
 0x3bf   :  { %2912 = vmatprep.subr.mxu1 %v3464_v6 }
 0x3c0   :  { %2913 = vmatpush3.msra.mxu1 %v3590_v9 }
 0x3c1   :  { %2914 = vmatprep.subr.mxu1 %v3464_v6 }
 0x3c2   :  { %2915 = vmatpush3.msra.mxu1 %v3597_v11 }
 0x3c3   :  { %2916 = vmatprep.subr.mxu1 %v3464_v6 }
 0x3c4   :  { %2917 = vmatpush3.msra.mxu1 %v3601_v12 }
 0x3c5   :  { %2919 = vmatmul.mubr.msk.f32.vlgmr.msra.gmra.mxu1 %vm233_vm1, %v427_v51  ;;  %2932 = vmatprep.subr.mxu1 %v3464_v6 }
 0x3c6   :  { %2933 = vmatpush3.msra.mxu1 %v3648_v41  ;;  %2940 = vmatprep.mubr.msk.f32.mxu1 %vm3465_vm2, %v3464_v6 }
 0x3c7   :  { %2934 = vmatprep.subr.mxu1 %v3464_v6 }
 0x3c8   :  { %2935 = vmatpush3.msra.mxu1 %v3652_v42 }
 0x3c9   :  { %2936 = vmatprep.subr.mxu1 %v3464_v6 }
 0x3ca   :  { %2937 = vmatpush3.msra.mxu1 %v3658_v44 }
 0x3cb   :  { %2938 = vmatprep.subr.mxu1 %v3464_v6 }
 0x3cc   :  { %2939 = vmatpush3.msra.mxu1 %v3675_v47 }
 0x3cd   :  { %2954 = vmatprep.subr.mxu1 %v3464_v6 }
 0x40c   :  { %v570_v52 = vpop.f32.mrf.mxu0 }
 0x40e   :  { %v2909_v53 = vpop.f32.mrf.mxu0 }
 0x47d   :  { %v496_v54 = vpop.f32.mrf.mxu1 }
 0x47e   :  { %v497_v58 = vadd.f32 %v3716_v56, %v496_v54 }
 0x47f   :  { %v2898_v55 = vpop.f32.mrf.mxu1 }
 0x480   :  { %v574_v62 = vadd.f32 %v570_v52, %v497_v58 }
 0x482   :  { %v2686_v2 = vmul.f32 -1.442695, %v574_v62 }
 0x485   :  { %v665_v57 = vpop.f32.mrf.mxu1 }
 0x486   :  { %v670_v59 = vrot.slane %v665_v57, 6 }
 0x487   :  { %v2920_v60 = vpop.f32.mrf.mxu1 }
 0x488   :  { %v672_v61 = vadd.f32 %v670_v59, %v3629_v25 }
 0x48a   :  { %3174 = vtanh.f32 %v672_v61  ;;  %v2688_v1 = vmul.f32 -1.442695, %v672_v61 }
 0x48b   :  { %3176 = vtanh.f32 %v574_v62 }
 0x48c   :  { %3178 = vpow2.f32 %v2688_v1 }
 0x48d   :  { %3180 = vpow2.f32 %v2686_v2 }
 0x497   :  { %v3175_v63 = vpop.eup %3174 }
 0x498   :  { %685 = vrot.lane.b32.xlu0 %v3175_v63, %s3466_s4  ;;  %v3177_v0 = vpop.eup %3176 }
 0x499   :  { %v3179_v3 = vpop.eup %3178 }
 0x49a   :  { %v676_v4 = vadd.f32 1.0, %v3179_v3  ;;  %v3181_v5 = vpop.eup %3180 }
 0x49b   :  { %v578_v8 = vadd.f32 1.0, %v3181_v5 }
 0x49c   :  { %584 = vrot.lane.b32.xlu0 %v3177_v0, %s3466_s4  ;;  %3182 = vrcp.f32 %v676_v4 }
 0x49d   :  { %3184 = vrcp.f32 %v578_v8 }
 0x4a9   :  { %v3183_v10 = vpop.eup %3182 }
 0x4aa   :  { %v3185_v15 = vpop.eup %3184  ;;  %v683_v19 = vmul.f32 %v3183_v10, %v681_v18 }
 0x4ab   :  { %v582_v22 = vmul.f32 %v3185_v15, %v3636_v28 }
 0x50a   :  { %v686_v13 = vpop.permute.xlu0 %685 }
 0x50b   :  { %v688_v14 = vmul.f32 %v3183_v10, %v686_v13 }
 0x50d   :  { %690 = vrot.lane.b32.xlu1 %v688_v14, %s3466_s4 }
 0x50e   :  { %v585_v16 = vpop.permute.xlu0 %584 }
 0x50f   :  { %v587_v17 = vmul.f32 %v3185_v15, %v585_v16 }
 0x511   :  { %589 = vrot.lane.b32.xlu1 %v587_v17, %s3466_s4 }
 0x57f   :  { %v691_v20 = vpop.permute.xlu1 %690 }
 0x580   :  { %v3725_v21 = vadd.f32 %v691_v20, %v683_v19 }
 0x582   :  { %3186 = vtanh.f32 %v3725_v21  ;;  %v958_v13 = vrot.slane %v3725_v21, 6 }
 0x583   :  { %v590_v24 = vpop.permute.xlu1 %589 }
 0x584   :  { %v3729_v26 = vadd.f32 %v590_v24, %v582_v22 }
 0x586   :  { %3188 = vtanh.f32 %v3729_v26 }
 0x58f   :  { %v3187_v27 = vpop.eup %3186 }
 0x590   :  { %696 = vrot.lane.b32.xlu0 %v3187_v27, %s3466_s4 }
 0x593   :  { %v3189_v29 = vpop.eup %3188 }
 0x594   :  { %595 = vrot.lane.b32.xlu0 %v3189_v29, %s3466_s4 }
 0x602   :  { %v697_v30 = vpop.permute.xlu0 %696 }
 0x603   :  { %v699_v31 = vmul.f32 %v3183_v10, %v697_v30 }
 0x605   :  { %v701_v32 = vrot.slane %v699_v31, 2 }
 0x606   :  { %v596_v33 = vpop.permute.xlu0 %595 }
 0x607   :  { %702 = vrot.lane.b32.xlu1 %v701_v32, %s3468_s7  ;;  %v598_v34 = vmul.f32 %v3185_v15, %v596_v33 }
 0x60b   :  { %777 = vrot.lane.b32.xlu1 %v598_v34, %s3468_s7 }
 0x679   :  { %v703_v28 = vpop.permute.xlu1 %702 }
 0x67a   :  { %2930 = vmatmul.mubr.msk.f32.vlgmr.msra.gmra.mxu0 %vm233_vm1, %v703_v28 }
 0x67b   :  { %2944 = vmatpush3.msra.mxu0 %v3583_v7  ;;  %2951 = vmatprep.mubr.msk.f32.mxu0 %vm3465_vm2, %v3464_v6 }
 0x67c   :  { %2945 = vmatprep.subr.mxu0 %v3464_v6 }
 0x67d   :  { %2946 = vmatpush3.msra.mxu0 %v3590_v9  ;;  %v778_v35 = vpop.permute.xlu1 %777 }
 0x67e   :  { %2947 = vmatprep.subr.mxu0 %v3464_v6  ;;  %2941 = vmatmul.mubr.msk.f32.vlgmr.msra.gmra.mxu1 %vm233_vm1, %v778_v35 }
 0x67f   :  { %2948 = vmatpush3.msra.mxu0 %v3597_v11  ;;  %2955 = vmatpush3.msra.mxu1 %v3644_v39 }
 0x680   :  { %2949 = vmatprep.subr.mxu0 %v3464_v6  ;;  %2956 = vmatprep.subr.mxu1 %v3464_v6 }
 0x681   :  { %2950 = vmatpush3.msra.mxu0 %v3601_v12  ;;  %2957 = vmatpush3.msra.mxu1 %v3646_v40 }
 0x682   :  { %2952 = vmatmul.mubr.msk.f32.vlgmr.msra.gmra.mxu0 %vm233_vm1, %v703_v28  ;;  %2965 = vmatprep.subr.mxu0 %v3464_v6 }
 0x683   :  { %2966 = vmatpush3.msra.mxu0 %v3648_v41  ;;  %2973 = vmatprep.mubr.msk.f32.mxu0 %vm3465_vm2, %v3464_v6 }
 0x684   :  { %2967 = vmatprep.subr.mxu0 %v3464_v6  ;;  %2958 = vmatprep.subr.mxu1 %v3464_v6 }
 0x685   :  { %2968 = vmatpush3.msra.mxu0 %v3652_v42  ;;  %2959 = vmatpush3.msra.mxu1 %v3655_v43 }
 0x686   :  { %2969 = vmatprep.subr.mxu0 %v3464_v6  ;;  %2960 = vmatprep.subr.mxu1 %v3464_v6 }
 0x687   :  { %2970 = vmatpush3.msra.mxu0 %v3658_v44  ;;  %2961 = vmatpush3.msra.mxu1 %v3663_v45 }
 0x688   :  { %2971 = vmatprep.subr.mxu0 %v3464_v6  ;;  %2962 = vmatprep.mubr.msk.f32.mxu1 %vm3465_vm2, %v3464_v6 }
 0x689   :  { %2972 = vmatpush3.msra.mxu0 %v3675_v47  ;;  %2976 = vmatprep.subr.mxu1 %v3464_v6 }
 0x68a   :  { %2987 = vmatprep.subr.mxu0 %v3464_v6 }
 0x73a   :  { %v772_v36 = vpop.f32.mrf.mxu0 }
 0x73b   :  { %v773_v38 = vadd.f32 %v3716_v56, %v772_v36 }
 0x73c   :  { %v2931_v37 = vpop.f32.mrf.mxu0 }
 0x73e   :  { %v847_v46 = vpop.f32.mrf.mxu1 }
 0x73f   :  { %v851_v48 = vadd.f32 %v847_v46, %v773_v38 }
 0x740   :  { %v2942_v49 = vpop.f32.mrf.mxu1 }
 0x741   :  { %3190 = vtanh.f32 %v851_v48  ;;  %v2691_v57 = vmul.f32 -1.442695, %v851_v48 }
 0x742   :  { %v942_v50 = vpop.f32.mrf.mxu0 }
 0x743   :  { %v947_v51 = vrot.slane %v942_v50, 4 }
 0x744   :  { %v2953_v52 = vpop.f32.mrf.mxu0 }
 0x745   :  { %v949_v53 = vadd.f32 %v947_v51, %v3629_v25 }
 0x747   :  { %3192 = vtanh.f32 %v949_v53  ;;  %v2693_v58 = vmul.f32 -1.442695, %v949_v53 }
 0x748   :  { %3194 = vpow2.f32 %v2691_v57 }
 0x749   :  { %3196 = vpow2.f32 %v2693_v58 }
 0x74e   :  { %v3191_v54 = vpop.eup %3190 }
 0x74f   :  { %861 = vrot.lane.b32.xlu1 %v3191_v54, %s3466_s4 }
 0x754   :  { %v3193_v55 = vpop.eup %3192 }
 0x755   :  { %962 = vrot.lane.b32.xlu0 %v3193_v55, %s3466_s4  ;;  %v3195_v59 = vpop.eup %3194 }
 0x756   :  { %v855_v60 = vadd.f32 1.0, %v3195_v59  ;;  %v3197_v61 = vpop.eup %3196 }
 0x757   :  { %v953_v62 = vadd.f32 1.0, %v3197_v61 }
 0x758   :  { %3198 = vrcp.f32 %v855_v60 }
 0x759   :  { %3200 = vrcp.f32 %v953_v62 }
 0x765   :  { %v3199_v63 = vpop.eup %3198 }
 0x766   :  { %v3201_v2 = vpop.eup %3200  ;;  %v859_v5 = vmul.f32 %v3199_v63, %v3729_v26 }
 0x767   :  { %v960_v14 = vmul.f32 %v3201_v2, %v958_v13 }
 0x7c1   :  { %v862_v0 = vpop.permute.xlu1 %861 }
 0x7c2   :  { %v864_v1 = vmul.f32 %v3199_v63, %v862_v0 }
 0x7c4   :  { %866 = vrot.lane.b32.xlu1 %v864_v1, %s3466_s4 }
 0x7c7   :  { %v963_v3 = vpop.permute.xlu0 %962 }
 0x7c8   :  { %v965_v4 = vmul.f32 %v3201_v2, %v963_v3 }
 0x7ca   :  { %967 = vrot.lane.b32.xlu0 %v965_v4, %s3466_s4 }
 0x836   :  { %v867_v8 = vpop.permute.xlu1 %866 }
 0x837   :  { %v3776_v10 = vadd.f32 %v867_v8, %v859_v5 }
 0x839   :  { %3202 = vtanh.f32 %v3776_v10 }
 0x83c   :  { %v968_v15 = vpop.permute.xlu0 %967 }
 0x83d   :  { %v3780_v16 = vadd.f32 %v968_v15, %v960_v14 }
 0x83f   :  { %3204 = vtanh.f32 %v3780_v16 }
 0x846   :  { %v3203_v17 = vpop.eup %3202 }
 0x847   :  { %872 = vrot.lane.b32.xlu1 %v3203_v17, %s3466_s4 }
 0x84c   :  { %v3205_v18 = vpop.eup %3204 }
 0x84d   :  { %973 = vrot.lane.b32.xlu0 %v3205_v18, %s3466_s4 }
 0x8b9   :  { %v873_v19 = vpop.permute.xlu1 %872 }
 0x8ba   :  { %v875_v20 = vmul.f32 %v3199_v63, %v873_v19  ;;  %v1235_v63 = vrot.slane %v3780_v16, 6 }
 0x8bc   :  { %1054 = vrot.lane.b32.xlu1 %v875_v20, %s3468_s7 }
 0x8bf   :  { %v974_v22 = vpop.permute.xlu0 %973 }
 0x8c0   :  { %v976_v21 = vmul.f32 %v3201_v2, %v974_v22 }
 0x8c2   :  { %v978_v24 = vrot.slane %v976_v21, 4 }
 0x8c4   :  { %979 = vrot.lane.b32.xlu0 %v978_v24, %s3468_s7 }
 0x92e   :  { %v1055_v26 = vpop.permute.xlu1 %1054 }
 0x92f   :  { %2974 = vmatmul.mubr.msk.f32.vlgmr.msra.gmra.mxu0 %vm233_vm1, %v1055_v26 }
 0x930   :  { %2988 = vmatpush3.msra.mxu0 %v3644_v39  ;;  %2995 = vmatprep.mubr.msk.f32.mxu0 %vm3465_vm2, %v3464_v6 }
 0x931   :  { %2989 = vmatprep.subr.mxu0 %v3464_v6 }
 0x932   :  { %2990 = vmatpush3.msra.mxu0 %v3646_v40 }
 0x933   :  { %2991 = vmatprep.subr.mxu0 %v3464_v6 }
 0x934   :  { %2992 = vmatpush3.msra.mxu0 %v3655_v43 }
 0x935   :  { %2993 = vmatprep.subr.mxu0 %v3464_v6 }
 0x936   :  { %v980_v27 = vpop.permute.xlu0 %979  ;;  %2994 = vmatpush3.msra.mxu0 %v3663_v45 }
 0x937   :  { %2963 = vmatmul.mubr.msk.f32.vlgmr.msra.gmra.mxu1 %vm233_vm1, %v980_v27  ;;  %3009 = vmatprep.subr.mxu0 %v3464_v6 }
 0x938   :  { %2977 = vmatpush3.msra.mxu1 %v3583_v7  ;;  %2984 = vmatprep.mubr.msk.f32.mxu1 %vm3465_vm2, %v3464_v6 }
 0x939   :  { %2978 = vmatprep.subr.mxu1 %v3464_v6 }
 0x93a   :  { %2979 = vmatpush3.msra.mxu1 %v3590_v9 }
 0x93b   :  { %2980 = vmatprep.subr.mxu1 %v3464_v6 }
 0x93c   :  { %2981 = vmatpush3.msra.mxu1 %v3597_v11 }
 0x93d   :  { %2982 = vmatprep.subr.mxu1 %v3464_v6 }
 0x93e   :  { %2983 = vmatpush3.msra.mxu1 %v3601_v12 }
 0x93f   :  { %2985 = vmatmul.mubr.msk.f32.vlgmr.msra.gmra.mxu1 %vm233_vm1, %v980_v27  ;;  %2998 = vmatprep.subr.mxu1 %v3464_v6 }
 0x940   :  { %2999 = vmatpush3.msra.mxu1 %v3648_v41  ;;  %3006 = vmatprep.mubr.msk.f32.mxu1 %vm3465_vm2, %v3464_v6 }
 0x941   :  { %3000 = vmatprep.subr.mxu1 %v3464_v6 }
 0x942   :  { %3001 = vmatpush3.msra.mxu1 %v3652_v42 }
 0x943   :  { %3002 = vmatprep.subr.mxu1 %v3464_v6 }
 0x944   :  { %3003 = vmatpush3.msra.mxu1 %v3658_v44 }
 0x945   :  { %3004 = vmatprep.subr.mxu1 %v3464_v6 }
 0x946   :  { %3005 = vmatpush3.msra.mxu1 %v3675_v47 }
 0x947   :  { %3020 = vmatprep.subr.mxu1 %v3464_v6 }
 0x9ef   :  { %v1124_v29 = vpop.f32.mrf.mxu0 }
 0x9f1   :  { %v2975_v30 = vpop.f32.mrf.mxu0 }
 0x9f7   :  { %v1049_v31 = vpop.f32.mrf.mxu1 }
 0x9f8   :  { %v1050_v32 = vadd.f32 %v3716_v56, %v1049_v31 }
 0x9f9   :  { %v2964_v33 = vpop.f32.mrf.mxu1 }
 0x9fa   :  { %v1128_v34 = vadd.f32 %v1124_v29, %v1050_v32 }
 0x9fc   :  { %3206 = vtanh.f32 %v1128_v34  ;;  %v2696_v48 = vmul.f32 -1.442695, %v1128_v34 }
 0x9ff   :  { %v1219_v28 = vpop.f32.mrf.mxu1 }
 0xa00   :  { %v1224_v35 = vrot.slane %v1219_v28, 2 }
 0xa01   :  { %v2986_v36 = vpop.f32.mrf.mxu1 }
 0xa02   :  { %v1226_v37 = vadd.f32 %v1224_v35, %v3629_v25 }
 0xa04   :  { %3208 = vtanh.f32 %v1226_v37  ;;  %v2698_v49 = vmul.f32 -1.442695, %v1226_v37 }
 0xa05   :  { %3210 = vpow2.f32 %v2696_v48 }
 0xa06   :  { %3212 = vpow2.f32 %v2698_v49 }
 0xa09   :  { %v3207_v38 = vpop.eup %3206 }
 0xa0a   :  { %1138 = vrot.lane.b32.xlu1 %v3207_v38, %s3466_s4 }
 0xa11   :  { %v3209_v46 = vpop.eup %3208 }
 0xa12   :  { %1239 = vrot.lane.b32.xlu0 %v3209_v46, %s3466_s4  ;;  %v3211_v50 = vpop.eup %3210 }
 0xa13   :  { %v1132_v51 = vadd.f32 1.0, %v3211_v50  ;;  %v3213_v52 = vpop.eup %3212 }
 0xa14   :  { %v1230_v53 = vadd.f32 1.0, %v3213_v52 }
 0xa15   :  { %3214 = vrcp.f32 %v1132_v51 }
 0xa16   :  { %3216 = vrcp.f32 %v1230_v53 }
 0xa22   :  { %v3215_v54 = vpop.eup %3214 }
 0xa23   :  { %v3217_v57 = vpop.eup %3216  ;;  %v1136_v60 = vmul.f32 %v3215_v54, %v3776_v10 }
 0xa24   :  { %v1237_v0 = vmul.f32 %v3217_v57, %v1235_v63 }
 0xa7c   :  { %v1139_v55 = vpop.permute.xlu1 %1138 }
 0xa7d   :  { %v1141_v25 = vmul.f32 %v3215_v54, %v1139_v55 }
 0xa7f   :  { %1143 = vrot.lane.b32.xlu1 %v1141_v25, %s3466_s4 }
 0xa84   :  { %v1240_v58 = vpop.permute.xlu0 %1239 }
 0xa85   :  { %v1242_v59 = vmul.f32 %v3217_v57, %v1240_v58 }
 0xa87   :  { %1244 = vrot.lane.b32.xlu0 %v1242_v59, %s3466_s4 }
 0xaf1   :  { %v1144_v61 = vpop.permute.xlu1 %1143 }
 0xaf2   :  { %v3827_v62 = vadd.f32 %v1144_v61, %v1136_v60 }
 0xaf4   :  { %3218 = vtanh.f32 %v3827_v62 }
 0xaf9   :  { %v1245_v1 = vpop.permute.xlu0 %1244 }
 0xafa   :  { %v3831_v2 = vadd.f32 %v1245_v1, %v1237_v0 }
 0xafc   :  { %3220 = vtanh.f32 %v3831_v2  ;;  %v1509_v53 = vrot.slane %v3831_v2, 6 }
 0xb01   :  { %v3219_v3 = vpop.eup %3218 }
 0xb02   :  { %1149 = vrot.lane.b32.xlu1 %v3219_v3, %s3466_s4 }
 0xb09   :  { %v3221_v4 = vpop.eup %3220 }
 0xb0a   :  { %1250 = vrot.lane.b32.xlu0 %v3221_v4, %s3466_s4 }
 0xb74   :  { %v1150_v5 = vpop.permute.xlu1 %1149 }
 0xb75   :  { %v1152_v8 = vmul.f32 %v3215_v54, %v1150_v5 }
 0xb77   :  { %1331 = vrot.lane.b32.xlu1 %v1152_v8, %s3468_s7 }
 0xb7c   :  { %v1251_v10 = vpop.permute.xlu0 %1250 }
 0xb7d   :  { %v1253_v13 = vmul.f32 %v3217_v57, %v1251_v10 }
 0xb7f   :  { %v1255_v14 = vrot.slane %v1253_v13, 6 }
 0xb81   :  { %1256 = vrot.lane.b32.xlu0 %v1255_v14, %s3468_s7 }
 0xbe9   :  { %v1332_v15 = vpop.permute.xlu1 %1331 }
 0xbea   :  { %3007 = vmatmul.mubr.msk.f32.vlgmr.msra.gmra.mxu1 %vm233_vm1, %v1332_v15 }
 0xbeb   :  { %3021 = vmatpush3.msra.mxu1 %v3644_v39  ;;  %3028 = vmatprep.mubr.msk.f32.mxu1 %vm3465_vm2, %v3464_v6 }
 0xbec   :  { %3022 = vmatprep.subr.mxu1 %v3464_v6 }
 0xbed   :  { %3023 = vmatpush3.msra.mxu1 %v3646_v40 }
 0xbee   :  { %3024 = vmatprep.subr.mxu1 %v3464_v6 }
 0xbef   :  { %3025 = vmatpush3.msra.mxu1 %v3655_v43 }
 0xbf0   :  { %3026 = vmatprep.subr.mxu1 %v3464_v6 }
 0xbf1   :  { %3027 = vmatpush3.msra.mxu1 %v3663_v45 }
 0xbf2   :  { %3042 = vmatprep.subr.mxu1 %v3464_v6 }
 0xbf3   :  { %v1257_v16 = vpop.permute.xlu0 %1256 }
 0xbf4   :  { %2996 = vmatmul.mubr.msk.f32.vlgmr.msra.gmra.mxu0 %vm233_vm1, %v1257_v16 }
 0xbf5   :  { %3010 = vmatpush3.msra.mxu0 %v3583_v7  ;;  %3017 = vmatprep.mubr.msk.f32.mxu0 %vm3465_vm2, %v3464_v6 }
 0xbf6   :  { %3011 = vmatprep.subr.mxu0 %v3464_v6 }
 0xbf7   :  { %3012 = vmatpush3.msra.mxu0 %v3590_v9 }
 0xbf8   :  { %3013 = vmatprep.subr.mxu0 %v3464_v6 }
 0xbf9   :  { %3014 = vmatpush3.msra.mxu0 %v3597_v11 }
 0xbfa   :  { %3015 = vmatprep.subr.mxu0 %v3464_v6 }
 0xbfb   :  { %3016 = vmatpush3.msra.mxu0 %v3601_v12 }
 0xbfc   :  { %3018 = vmatmul.mubr.msk.f32.vlgmr.msra.gmra.mxu0 %vm233_vm1, %v1257_v16  ;;  %3031 = vmatprep.subr.mxu0 %v3464_v6 }
 0xbfd   :  { %3032 = vmatpush3.msra.mxu0 %v3648_v41  ;;  %3039 = vmatprep.mubr.msk.f32.mxu0 %vm3465_vm2, %v3464_v6 }
 0xbfe   :  { %3033 = vmatprep.subr.mxu0 %v3464_v6 }
 0xbff   :  { %3034 = vmatpush3.msra.mxu0 %v3652_v42 }
 0xc00   :  { %3035 = vmatprep.subr.mxu0 %v3464_v6 }
 0xc01   :  { %3036 = vmatpush3.msra.mxu0 %v3658_v44 }
 0xc02   :  { %3037 = vmatprep.subr.mxu0 %v3464_v6 }
 0xc03   :  { %3038 = vmatpush3.msra.mxu0 %v3675_v47 }
 0xc04   :  { %3053 = vmatprep.subr.mxu0 %v3464_v6 }
 0xcaa   :  { %v1401_v17 = vpop.f32.mrf.mxu1 }
 0xcac   :  { %v3008_v18 = vpop.f32.mrf.mxu1 }
 0xcb4   :  { %v1326_v19 = vpop.f32.mrf.mxu0 }
 0xcb5   :  { %v1327_v20 = vadd.f32 %v3716_v56, %v1326_v19 }
 0xcb6   :  { %v2997_v22 = vpop.f32.mrf.mxu0 }
 0xcb7   :  { %v1405_v21 = vadd.f32 %v1401_v17, %v1327_v20 }
 0xcb9   :  { %3222 = vtanh.f32 %v1405_v21  ;;  %v2701_v31 = vmul.f32 -1.442695, %v1405_v21 }
 0xcbc   :  { %v1496_v24 = vpop.f32.mrf.mxu0 }
 0xcbd   :  { %v1500_v26 = vadd.f32 %v1496_v24, %v3627_v23 }
 0xcbe   :  { %v3019_v27 = vpop.f32.mrf.mxu0 }
 0xcbf   :  { %3224 = vtanh.f32 %v1500_v26  ;;  %v2703_v32 = vmul.f32 -1.442695, %v1500_v26 }
 0xcc0   :  { %3226 = vpow2.f32 %v2701_v31 }
 0xcc1   :  { %3228 = vpow2.f32 %v2703_v32 }
 0xcc6   :  { %v3223_v29 = vpop.eup %3222 }
 0xcc7   :  { %1415 = vrot.lane.b32.xlu1 %v3223_v29, %s3466_s4 }
 0xccc   :  { %v3225_v30 = vpop.eup %3224 }
 0xccd   :  { %1513 = vrot.lane.b32.xlu0 %v3225_v30, %s3466_s4  ;;  %v3227_v33 = vpop.eup %3226 }
 0xcce   :  { %v1409_v34 = vadd.f32 1.0, %v3227_v33  ;;  %v3229_v28 = vpop.eup %3228 }
 0xccf   :  { %v1504_v35 = vadd.f32 1.0, %v3229_v28 }
 0xcd0   :  { %3230 = vrcp.f32 %v1409_v34 }
 0xcd1   :  { %3232 = vrcp.f32 %v1504_v35 }
 0xcdd   :  { %v3231_v36 = vpop.eup %3230 }
 0xcde   :  { %v3233_v46 = vpop.eup %3232  ;;  %v1413_v50 = vmul.f32 %v3231_v36, %v3827_v62 }
 0xcdf   :  { %v1511_v54 = vmul.f32 %v3233_v46, %v1509_v53 }
 0xd39   :  { %v1416_v37 = vpop.permute.xlu1 %1415 }
 0xd3a   :  { %v1418_v38 = vmul.f32 %v3231_v36, %v1416_v37 }
 0xd3c   :  { %1420 = vrot.lane.b32.xlu1 %v1418_v38, %s3466_s4 }
 0xd3f   :  { %v1514_v48 = vpop.permute.xlu0 %1513 }
 0xd40   :  { %v1516_v49 = vmul.f32 %v3233_v46, %v1514_v48 }
 0xd42   :  { %1518 = vrot.lane.b32.xlu0 %v1516_v49, %s3466_s4 }
 0xdae   :  { %v1421_v51 = vpop.permute.xlu1 %1420 }
 0xdaf   :  { %v3878_v52 = vadd.f32 %v1421_v51, %v1413_v50 }
 0xdb1   :  { %3234 = vtanh.f32 %v3878_v52 }
 0xdb4   :  { %v1519_v55 = vpop.permute.xlu0 %1518 }
 0xdb5   :  { %v3882_v25 = vadd.f32 %v1519_v55, %v1511_v54 }
 0xdb7   :  { %3236 = vtanh.f32 %v3882_v25  ;;  %v1785_v32 = vrot.slane %v3882_v25, 6 }
 0xdbe   :  { %v3235_v57 = vpop.eup %3234 }
 0xdbf   :  { %1426 = vrot.lane.b32.xlu1 %v3235_v57, %s3466_s4 }
 0xdc4   :  { %v3237_v58 = vpop.eup %3236 }
 0xdc5   :  { %1524 = vrot.lane.b32.xlu0 %v3237_v58, %s3466_s4 }
 0xe31   :  { %v1427_v59 = vpop.permute.xlu1 %1426 }
 0xe32   :  { %v1429_v60 = vmul.f32 %v3231_v36, %v1427_v59 }
 0xe34   :  { %1604 = vrot.lane.b32.xlu1 %v1429_v60, %s3468_s7 }
 0xe37   :  { %v1525_v61 = vpop.permute.xlu0 %1524 }
 0xe38   :  { %v1527_v62 = vmul.f32 %v3233_v46, %v1525_v61 }
 0xe3a   :  { %1529 = vrot.lane.b32.xlu0 %v1527_v62, %s3468_s7 }
 0xea6   :  { %v1605_v63 = vpop.permute.xlu1 %1604 }
 0xea7   :  { %3040 = vmatmul.mubr.msk.f32.vlgmr.msra.gmra.mxu0 %vm233_vm1, %v1605_v63 }
 0xea8   :  { %3054 = vmatpush3.msra.mxu0 %v3644_v39  ;;  %3061 = vmatprep.mubr.msk.f32.mxu0 %vm3465_vm2, %v3464_v6 }
 0xea9   :  { %3055 = vmatprep.subr.mxu0 %v3464_v6 }
 0xeaa   :  { %3056 = vmatpush3.msra.mxu0 %v3646_v40 }
 0xeab   :  { %3057 = vmatprep.subr.mxu0 %v3464_v6 }
 0xeac   :  { %v1530_v0 = vpop.permute.xlu0 %1529  ;;  %3058 = vmatpush3.msra.mxu0 %v3655_v43 }
 0xead   :  { %3029 = vmatmul.mubr.msk.f32.vlgmr.msra.gmra.mxu1 %vm233_vm1, %v1530_v0  ;;  %3059 = vmatprep.subr.mxu0 %v3464_v6 }
 0xeae   :  { %3043 = vmatpush3.msra.mxu1 %v3583_v7  ;;  %3050 = vmatprep.mubr.msk.f32.mxu1 %vm3465_vm2, %v3464_v6 }
 0xeaf   :  { %3044 = vmatprep.subr.mxu1 %v3464_v6  ;;  %3060 = vmatpush3.msra.mxu0 %v3663_v45 }
 0xeb0   :  { %3045 = vmatpush3.msra.mxu1 %v3590_v9  ;;  %3075 = vmatprep.subr.mxu0 %v3464_v6 }
 0xeb1   :  { %3046 = vmatprep.subr.mxu1 %v3464_v6 }
 0xeb2   :  { %3047 = vmatpush3.msra.mxu1 %v3597_v11 }
 0xeb3   :  { %3048 = vmatprep.subr.mxu1 %v3464_v6 }
 0xeb4   :  { %3049 = vmatpush3.msra.mxu1 %v3601_v12 }
 0xeb5   :  { %3051 = vmatmul.mubr.msk.f32.vlgmr.msra.gmra.mxu1 %vm233_vm1, %v1530_v0  ;;  %3064 = vmatprep.subr.mxu1 %v3464_v6 }
 0xeb6   :  { %3065 = vmatpush3.msra.mxu1 %v3648_v41  ;;  %3072 = vmatprep.mubr.msk.f32.mxu1 %vm3465_vm2, %v3464_v6 }
 0xeb7   :  { %3066 = vmatprep.subr.mxu1 %v3464_v6 }
 0xeb8   :  { %3067 = vmatpush3.msra.mxu1 %v3652_v42 }
 0xeb9   :  { %3068 = vmatprep.subr.mxu1 %v3464_v6 }
 0xeba   :  { %3069 = vmatpush3.msra.mxu1 %v3658_v44 }
 0xebb   :  { %3070 = vmatprep.subr.mxu1 %v3464_v6 }
 0xebc   :  { %3071 = vmatpush3.msra.mxu1 %v3675_v47 }
 0xebd   :  { %3086 = vmatprep.subr.mxu1 %v3464_v6 }
 0xf67   :  { %v1674_v7 = vpop.f32.mrf.mxu0 }
 0xf69   :  { %v3041_v9 = vpop.f32.mrf.mxu0 }
 0xf6d   :  { %v1599_v11 = vpop.f32.mrf.mxu1 }
 0xf6e   :  { %v1600_v12 = vadd.f32 %v3716_v56, %v1599_v11 }
 0xf6f   :  { %v3030_v1 = vpop.f32.mrf.mxu1 }
 0xf70   :  { %v1678_v2 = vadd.f32 %v1674_v7, %v1600_v12 }
 0xf72   :  { %3238 = vtanh.f32 %v1678_v2  ;;  %v2706_v14 = vmul.f32 -1.442695, %v1678_v2 }
 0xf75   :  { %v1769_v3 = vpop.f32.mrf.mxu1 }
 0xf76   :  { %v1774_v4 = vrot.slane %v1769_v3, 6 }
 0xf77   :  { %v3052_v5 = vpop.f32.mrf.mxu1 }
 0xf78   :  { %v1776_v8 = vadd.f32 %v1774_v4, %v3627_v23 }
 0xf7a   :  { %3240 = vtanh.f32 %v1776_v8  ;;  %v2708_v15 = vmul.f32 -1.442695, %v1776_v8 }
 0xf7b   :  { %3242 = vpow2.f32 %v2706_v14 }
 0xf7c   :  { %3244 = vpow2.f32 %v2708_v15 }
 0xf7f   :  { %v3239_v10 = vpop.eup %3238 }
 0xf80   :  { %1688 = vrot.lane.b32.xlu1 %v3239_v10, %s3466_s4 }
 0xf87   :  { %v3241_v13 = vpop.eup %3240 }
 0xf88   :  { %1789 = vrot.lane.b32.xlu0 %v3241_v13, %s3466_s4  ;;  %v3243_v16 = vpop.eup %3242 }
 0xf89   :  { %v1682_v17 = vadd.f32 1.0, %v3243_v16  ;;  %v3245_v18 = vpop.eup %3244 }
 0xf8a   :  { %v1780_v19 = vadd.f32 1.0, %v3245_v18 }
 0xf8b   :  { %3246 = vrcp.f32 %v1682_v17 }
 0xf8c   :  { %3248 = vrcp.f32 %v1780_v19 }
 0xf98   :  { %v3247_v20 = vpop.eup %3246 }
 0xf99   :  { %v3249_v24 = vpop.eup %3248  ;;  %v1686_v29 = vmul.f32 %v3247_v20, %v3878_v52 }
 0xf9a   :  { %v1787_v33 = vmul.f32 %v3249_v24, %v1785_v32  ;;  %v3303_v32 = vld [vmem:[#allocation10 + $0x10] sm:$0xff] }
 0xff2   :  { %v1689_v22 = vpop.permute.xlu1 %1688 }
 0xff3   :  { %v1691_v21 = vmul.f32 %v3247_v20, %v1689_v22 }
 0xff5   :  { %1693 = vrot.lane.b32.xlu1 %v1691_v21, %s3466_s4 }
 0xffa   :  { %v1790_v26 = vpop.permute.xlu0 %1789 }
 0xffb   :  { %v1792_v27 = vmul.f32 %v3249_v24, %v1790_v26  ;;  %v3299_v26 = vld [vmem:[#allocation8 + $0x10] sm:$0xff] }
 0xffd   :  { %1794 = vrot.lane.b32.xlu0 %v1792_v27, %s3466_s4  ;;  %v3300_v27 = vld [vmem:[#allocation8 + $0x8] sm:$0xff] }
0x1067   :  { %v1694_v30 = vpop.permute.xlu1 %1693 }
0x1068   :  { %v3929_v31 = vadd.f32 %v1694_v30, %v1686_v29  ;;  %v3301_v29 = vld [vmem:[#allocation8] sm:$0xff] }
0x106a   :  { %3250 = vtanh.f32 %v3929_v31 }
0x106f   :  { %v1795_v34 = vpop.permute.xlu0 %1794 }
0x1070   :  { %v3933_v28 = vadd.f32 %v1795_v34, %v1787_v33  ;;  %v3304_v33 = vld [vmem:[#allocation10 + $0x8] sm:$0xff]  ;;  %v3305_v34 = vld [vmem:[#allocation10] sm:$0xff] }
0x1072   :  { %3252 = vtanh.f32 %v3933_v28  ;;  %v2062_v8 = vrot.slane %v3933_v28, 6 }
0x1077   :  { %v3251_v35 = vpop.eup %3250 }
0x1078   :  { %1699 = vrot.lane.b32.xlu1 %v3251_v35, %s3466_s4 }
0x107f   :  { %v3253_v36 = vpop.eup %3252 }
0x1080   :  { %1800 = vrot.lane.b32.xlu0 %v3253_v36, %s3466_s4 }
0x10ea   :  { %v1700_v37 = vpop.permute.xlu1 %1699 }
0x10eb   :  { %v1702_v38 = vmul.f32 %v3247_v20, %v1700_v37  ;;  %v3306_v37 = vld [vmem:[%s4085_s10] ss:$0 sm:$0xff] }
0x10ed   :  { %1881 = vrot.lane.b32.xlu1 %v1702_v38, %s3468_s7 }
0x10f2   :  { %v1801_v46 = vpop.permute.xlu0 %1800 }
0x10f3   :  { %v1803_v48 = vmul.f32 %v3249_v24, %v1801_v46  ;;  %v3298_v24 = vld [vmem:[#allocation8 + $0x18] sm:$0xff] }
0x10f5   :  { %v1805_v49 = vrot.slane %v1803_v48, 2 }
0x10f7   :  { %1806 = vrot.lane.b32.xlu0 %v1805_v49, %s3468_s7 }
0x115f   :  { %v1882_v50 = vpop.permute.xlu1 %1881 }
0x1160   :  { %3073 = vmatmul.mubr.msk.f32.vlgmr.msra.gmra.mxu1 %vm233_vm1, %v1882_v50 }
0x1161   :  { %3087 = vmatpush3.msra.mxu1 %v3644_v39  ;;  %3094 = vmatprep.mubr.msk.f32.mxu1 %vm3465_vm2, %v3464_v6  ;;  %v3952_v39 = vld [vmem:[#allocation7 + $0x18] sm:$0xff] }
0x1162   :  { %3088 = vmatprep.subr.mxu1 %v3464_v6 }
0x1163   :  { %3089 = vmatpush3.msra.mxu1 %v3646_v40  ;;  %v3958_v40 = vld [vmem:[#allocation7 + $0x10] sm:$0xff] }
0x1164   :  { %3090 = vmatprep.subr.mxu1 %v3464_v6 }
0x1165   :  { %3091 = vmatpush3.msra.mxu1 %v3655_v43  ;;  %v3962_v43 = vld [vmem:[#allocation7 + $0x8] sm:$0xff] }
0x1166   :  { %3092 = vmatprep.subr.mxu1 %v3464_v6 }
0x1167   :  { %3093 = vmatpush3.msra.mxu1 %v3663_v45  ;;  %v3966_v45 = vld [vmem:[#allocation7] sm:$0xff] }
0x1168   :  { %3108 = vmatprep.subr.mxu1 %v3464_v6 }
0x1169   :  { %v1807_v51 = vpop.permute.xlu0 %1806 }
0x116a   :  { %3062 = vmatmul.mubr.msk.f32.vlgmr.msra.gmra.mxu0 %vm233_vm1, %v1807_v51 }
0x116b   :  { %3076 = vmatpush3.msra.mxu0 %v3952_v39  ;;  %3083 = vmatprep.mubr.msk.f32.mxu0 %vm3465_vm2, %v3464_v6 }
0x116c   :  { %3077 = vmatprep.subr.mxu0 %v3464_v6 }
0x116d   :  { %3078 = vmatpush3.msra.mxu0 %v3958_v40 }
0x116e   :  { %3079 = vmatprep.subr.mxu0 %v3464_v6 }
0x116f   :  { %3080 = vmatpush3.msra.mxu0 %v3962_v43 }
0x1170   :  { %3081 = vmatprep.subr.mxu0 %v3464_v6 }
0x1171   :  { %3082 = vmatpush3.msra.mxu0 %v3966_v45 }
0x1172   :  { %3084 = vmatmul.mubr.msk.f32.vlgmr.msra.gmra.mxu0 %vm233_vm1, %v1807_v51  ;;  %3097 = vmatprep.subr.mxu0 %v3464_v6 }
0x1173   :  { %3098 = vmatpush3.msra.mxu0 %v3648_v41  ;;  %3105 = vmatprep.mubr.msk.f32.mxu0 %vm3465_vm2, %v3464_v6 }
0x1174   :  { %3099 = vmatprep.subr.mxu0 %v3464_v6 }
0x1175   :  { %3100 = vmatpush3.msra.mxu0 %v3652_v42 }
0x1176   :  { %3101 = vmatprep.subr.mxu0 %v3464_v6 }
0x1177   :  { %3102 = vmatpush3.msra.mxu0 %v3658_v44 }
0x1178   :  { %3103 = vmatprep.subr.mxu0 %v3464_v6 }
0x1179   :  { %3104 = vmatpush3.msra.mxu0 %v3675_v47 }
0x117a   :  { %3119 = vmatprep.subr.mxu0 %v3464_v6 }
0x1220   :  { %v1951_v52 = vpop.f32.mrf.mxu1 }
0x1222   :  { %v3074_v53 = vpop.f32.mrf.mxu1 }
0x122a   :  { %v1876_v41 = vpop.f32.mrf.mxu0 }
0x122b   :  { %v1877_v54 = vadd.f32 %v3716_v56, %v1876_v41 }
0x122c   :  { %v3063_v55 = vpop.f32.mrf.mxu0 }
0x122d   :  { %v1955_v25 = vadd.f32 %v1951_v52, %v1877_v54 }
0x122f   :  { %3254 = vtanh.f32 %v1955_v25  ;;  %v2711_v60 = vmul.f32 -1.442695, %v1955_v25 }
0x1232   :  { %v2046_v57 = vpop.f32.mrf.mxu0 }
0x1233   :  { %v2051_v42 = vrot.slane %v2046_v57, 4 }
0x1234   :  { %v3085_v58 = vpop.f32.mrf.mxu0 }
0x1235   :  { %v2053_v59 = vadd.f32 %v2051_v42, %v3627_v23 }
0x1237   :  { %3256 = vtanh.f32 %v2053_v59  ;;  %v2713_v61 = vmul.f32 -1.442695, %v2053_v59 }
0x1238   :  { %3258 = vpow2.f32 %v2711_v60 }
0x1239   :  { %3260 = vpow2.f32 %v2713_v61 }
0x123c   :  { %v3255_v44 = vpop.eup %3254 }
0x123d   :  { %1965 = vrot.lane.b32.xlu1 %v3255_v44, %s3466_s4 }
0x1244   :  { %v3257_v47 = vpop.eup %3256 }
0x1245   :  { %2066 = vrot.lane.b32.xlu0 %v3257_v47, %s3466_s4  ;;  %v3259_v56 = vpop.eup %3258 }
0x1246   :  { %v1959_v62 = vadd.f32 1.0, %v3259_v56  ;;  %v3261_v63 = vpop.eup %3260 }
0x1247   :  { %v2057_v0 = vadd.f32 1.0, %v3261_v63 }
0x1248   :  { %3262 = vrcp.f32 %v1959_v62 }
0x1249   :  { %3264 = vrcp.f32 %v2057_v0 }
0x1255   :  { %v3263_v7 = vpop.eup %3262 }
0x1256   :  { %v3265_v12 = vpop.eup %3264  ;;  %v1963_v3 = vmul.f32 %v3263_v7, %v3929_v31  ;;  %v3302_v31 = vld [vmem:[#allocation10 + $0x18] sm:$0xff] }
0x1257   :  { %v2064_v10 = vmul.f32 %v3265_v12, %v2062_v8 }
0x12af   :  { %v1966_v9 = vpop.permute.xlu1 %1965 }
0x12b0   :  { %v1968_v11 = vmul.f32 %v3263_v7, %v1966_v9 }
0x12b2   :  { %1970 = vrot.lane.b32.xlu1 %v1968_v11, %s3466_s4 }
0x12b7   :  { %v2067_v1 = vpop.permute.xlu0 %2066 }
0x12b8   :  { %v2069_v2 = vmul.f32 %v3265_v12, %v2067_v1 }
0x12ba   :  { %2071 = vrot.lane.b32.xlu0 %v2069_v2, %s3466_s4 }
0x1324   :  { %v1971_v4 = vpop.permute.xlu1 %1970 }
0x1325   :  { %v3988_v5 = vadd.f32 %v1971_v4, %v1963_v3 }
0x1327   :  { %3266 = vtanh.f32 %v3988_v5 }
0x132c   :  { %v2072_v13 = vpop.permute.xlu0 %2071 }
0x132d   :  { %v3992_v14 = vadd.f32 %v2072_v13, %v2064_v10 }
0x132f   :  { %3268 = vtanh.f32 %v3992_v14  ;;  %v2339_v61 = vrot.slane %v3992_v14, 6 }
0x1334   :  { %v3267_v15 = vpop.eup %3266 }
0x1335   :  { %1976 = vrot.lane.b32.xlu1 %v3267_v15, %s3466_s4 }
0x133c   :  { %v3269_v16 = vpop.eup %3268 }
0x133d   :  { %2077 = vrot.lane.b32.xlu0 %v3269_v16, %s3466_s4 }
0x13a7   :  { %v1977_v17 = vpop.permute.xlu1 %1976 }
0x13a8   :  { %v1979_v18 = vmul.f32 %v3263_v7, %v1977_v17 }
0x13aa   :  { %2158 = vrot.lane.b32.xlu1 %v1979_v18, %s3468_s7 }
0x13af   :  { %v2078_v19 = vpop.permute.xlu0 %2077 }
0x13b0   :  { %v2080_v20 = vmul.f32 %v3265_v12, %v2078_v19 }
0x13b2   :  { %v2082_v22 = vrot.slane %v2080_v20, 4 }
0x13b4   :  { %2083 = vrot.lane.b32.xlu0 %v2082_v22, %s3468_s7 }
0x141c   :  { %v2159_v21 = vpop.permute.xlu1 %2158 }
0x141d   :  { %3106 = vmatmul.mubr.msk.f32.vlgmr.msra.gmra.mxu0 %vm233_vm1, %v2159_v21 }
0x141e   :  { %3120 = vmatpush3.msra.mxu0 %v3298_v24  ;;  %3127 = vmatprep.mubr.msk.f32.mxu0 %vm3465_vm2, %v3464_v6 }
0x141f   :  { %3121 = vmatprep.subr.mxu0 %v3464_v6 }
0x1420   :  { %3122 = vmatpush3.msra.mxu0 %v3299_v26 }
0x1421   :  { %3123 = vmatprep.subr.mxu0 %v3464_v6 }
0x1422   :  { %3124 = vmatpush3.msra.mxu0 %v3300_v27 }
0x1423   :  { %3125 = vmatprep.subr.mxu0 %v3464_v6 }
0x1424   :  { %3126 = vmatpush3.msra.mxu0 %v3301_v29  ;;  %v2537_v29 = vld [vmem:[%s4086_s11 + $0x18] sm:$0xff] }
0x1425   :  { %3141 = vmatprep.subr.mxu0 %v3464_v6 }
0x1426   :  { %v2084_v30 = vpop.permute.xlu0 %2083 }
0x1427   :  { %3095 = vmatmul.mubr.msk.f32.vlgmr.msra.gmra.mxu1 %vm233_vm1, %v2084_v30 }
0x1428   :  { %3109 = vmatpush3.msra.mxu1 %v3952_v39  ;;  %3116 = vmatprep.mubr.msk.f32.mxu1 %vm3465_vm2, %v3464_v6 }
0x1429   :  { %3110 = vmatprep.subr.mxu1 %v3464_v6 }
0x142a   :  { %3111 = vmatpush3.msra.mxu1 %v3958_v40 }
0x142b   :  { %3112 = vmatprep.subr.mxu1 %v3464_v6 }
0x142c   :  { %3113 = vmatpush3.msra.mxu1 %v3962_v43 }
0x142d   :  { %3114 = vmatprep.subr.mxu1 %v3464_v6 }
0x142e   :  { %3115 = vmatpush3.msra.mxu1 %v3966_v45 }
0x142f   :  { %3117 = vmatmul.mubr.msk.f32.vlgmr.msra.gmra.mxu1 %vm233_vm1, %v2084_v30  ;;  %3130 = vmatprep.subr.mxu1 %v3464_v6  ;;  %v2536_v30 = vld [vmem:[%s4086_s11 + $0x10] sm:$0xff] }
0x1430   :  { %3131 = vmatpush3.msra.mxu1 %v3302_v31  ;;  %3138 = vmatprep.mubr.msk.f32.mxu1 %vm3465_vm2, %v3464_v6 }
0x1431   :  { %3132 = vmatprep.subr.mxu1 %v3464_v6 }
0x1432   :  { %3133 = vmatpush3.msra.mxu1 %v3303_v32  ;;  %v2535_v32 = vld [vmem:[%s4086_s11 + $0x8] sm:$0xff] }
0x1433   :  { %3134 = vmatprep.subr.mxu1 %v3464_v6 }
0x1434   :  { %3135 = vmatpush3.msra.mxu1 %v3304_v33  ;;  %v2534_v33 = vld [vmem:[%s4086_s11] sm:$0xff]  ;;  %s3469_s11 = smov [#allocation12]  }
0x1435   :  { %3136 = vmatprep.subr.mxu1 %v3464_v6  ;;  %s2660_s19 = sshll.u32 %s3469_s11, 4  ;;  %s2661_s19 = int_to_ptr.vmem [resolvable:$true] %s2660_s19 }
0x1436   :  { %3137 = vmatpush3.msra.mxu1 %v3305_v34  ;;  %s3407_s24 = scalar_lea.vmem %s2661_s19, 32  ;;  %p3412_p12 = scmp.lt.s32.totalorder %s2661_s19, %s2661_s19 }
0x1437   :  { %p3408_p11 = scmp.ne.s32.totalorder %s2661_s19, %s3407_s24  ;;  %p3413_p13 = scmp.lt.s32.totalorder %s3407_s24, %s3407_s24 }
0x1439   :  { %p3414_p0 = por %p3413_p13, %p3412_p12 }
0x143b   :  { %p3415_p1 = pnand %p3414_p0, %p3408_p11 }
0x14dd   :  { %v2228_v28 = vpop.f32.mrf.mxu0 }
0x14df   :  { %v3107_v35 = vpop.f32.mrf.mxu0 }
0x14e7   :  { %v2153_v36 = vpop.f32.mrf.mxu1 }
0x14e8   :  { %v2154_v38 = vadd.f32 %v3306_v37, %v2153_v36 }
0x14e9   :  { %v3096_v46 = vpop.f32.mrf.mxu1 }
0x14ea   :  { %v2232_v48 = vadd.f32 %v2228_v28, %v2154_v38 }
0x14ec   :  { %3270 = vtanh.f32 %v2232_v48  ;;  %v2716_v45 = vmul.f32 -1.442695, %v2232_v48 }
0x14ef   :  { %v2323_v49 = vpop.f32.mrf.mxu1 }
0x14f0   :  { %v2328_v50 = vrot.slane %v2323_v49, 2 }
0x14f1   :  { %v3118_v51 = vpop.f32.mrf.mxu1 }
0x14f2   :  { %v2330_v39 = vadd.f32 %v2328_v50, %v3627_v23 }
0x14f4   :  { %3272 = vtanh.f32 %v2330_v39  ;;  %v2718_v52 = vmul.f32 -1.442695, %v2330_v39 }
0x14f5   :  { %3274 = vpow2.f32 %v2716_v45 }
0x14f6   :  { %3276 = vpow2.f32 %v2718_v52 }
0x14f9   :  { %v3271_v40 = vpop.eup %3270 }
0x14fa   :  { %2242 = vrot.lane.b32.xlu1 %v3271_v40, %s3466_s4 }
0x1501   :  { %v3273_v43 = vpop.eup %3272 }
0x1502   :  { %2343 = vrot.lane.b32.xlu0 %v3273_v43, %s3466_s4  ;;  %v3275_v53 = vpop.eup %3274 }
0x1503   :  { %v2236_v41 = vadd.f32 1.0, %v3275_v53  ;;  %v3277_v54 = vpop.eup %3276 }
0x1504   :  { %v2334_v55 = vadd.f32 1.0, %v3277_v54 }
0x1505   :  { %3278 = vrcp.f32 %v2236_v41 }
0x1506   :  { %3280 = vrcp.f32 %v2334_v55 }
0x1512   :  { %v3279_v25 = vpop.eup %3278 }
0x1513   :  { %v3281_v42 = vpop.eup %3280  ;;  %v2240_v44 = vmul.f32 %v3279_v25, %v3988_v5 }
0x1514   :  { %v2341_v56 = vmul.f32 %v3281_v42, %v2339_v61 }
0x156c   :  { %v2243_v57 = vpop.permute.xlu1 %2242 }
0x156d   :  { %v2245_v23 = vmul.f32 %v3279_v25, %v2243_v57 }
0x156f   :  { %2247 = vrot.lane.b32.xlu1 %v2245_v23, %s3466_s4 }
0x1574   :  { %v2344_v58 = vpop.permute.xlu0 %2343 }
0x1575   :  { %v2346_v59 = vmul.f32 %v3281_v42, %v2344_v58 }
0x1577   :  { %2348 = vrot.lane.b32.xlu0 %v2346_v59, %s3466_s4 }
0x15e1   :  { %v2248_v47 = vpop.permute.xlu1 %2247 }
0x15e2   :  { %v2250_v60 = vadd.f32 %v2248_v47, %v2240_v44 }
0x15e4   :  { %3282 = vtanh.f32 %v2250_v60 }
0x15e9   :  { %v2349_v62 = vpop.permute.xlu0 %2348 }
0x15ea   :  { %v2351_v63 = vadd.f32 %v2349_v62, %v2341_v56 }
0x15ec   :  { %3284 = vtanh.f32 %v2351_v63 }
0x15f1   :  { %v3283_v0 = vpop.eup %3282 }
0x15f2   :  { %2253 = vrot.lane.b32.xlu1 %v3283_v0, %s3466_s4 }
0x15f9   :  { %v3285_v7 = vpop.eup %3284 }
0x15fa   :  { %2354 = vrot.lane.b32.xlu0 %v3285_v7, %s3466_s4 }
0x1664   :  { %v2254_v9 = vpop.permute.xlu1 %2253 }
0x1665   :  { %v2256_v11 = vmul.f32 %v3279_v25, %v2254_v9 }
0x1667   :  { %2435 = vrot.lane.b32.xlu1 %v2256_v11, %s3468_s7 }
0x166c   :  { %v2355_v12 = vpop.permute.xlu0 %2354 }
0x166d   :  { %v2357_v1 = vmul.f32 %v3281_v42, %v2355_v12 }
0x166f   :  { %v2359_v2 = vrot.slane %v2357_v1, 6 }
0x1671   :  { %2360 = vrot.lane.b32.xlu0 %v2359_v2, %s3468_s7 }
0x16d9   :  { %v2436_v3 = vpop.permute.xlu1 %2435 }
0x16da   :  { %3139 = vmatmul.mubr.msk.f32.vlgmr.msra.gmra.mxu1 %vm233_vm1, %v2436_v3 }
0x16e3   :  { %v2361_v4 = vpop.permute.xlu0 %2360 }
0x16e4   :  { %3128 = vmatmul.mubr.msk.f32.vlgmr.msra.gmra.mxu0 %vm233_vm1, %v2361_v4 }
0x16e5   :  { %3149 = vmatprep.mubr.msk.f32.mxu0 %vm3465_vm2, %v3464_v6  ;;  %3142 = vmatpush3.msra.mxu0 %v2537_v29 }
0x16e6   :  { %3143 = vmatprep.subr.mxu0 %v3464_v6 }
0x16e7   :  { %3144 = vmatpush3.msra.mxu0 %v2536_v30 }
0x16e8   :  { %3145 = vmatprep.subr.mxu0 %v3464_v6 }
0x16e9   :  { %3146 = vmatpush3.msra.mxu0 %v2535_v32 }
0x16ea   :  { %3147 = vmatprep.subr.mxu0 %v3464_v6 }
0x16eb   :  { %3148 = vmatpush3.msra.mxu0 %v2534_v33 }
0x179a   :  { %v2505_v5 = vpop.f32.mrf.mxu1 }
0x179c   :  { %v3140_v8 = vpop.f32.mrf.mxu1 }
0x17a4   :  { %v2430_v10 = vpop.f32.mrf.mxu0 }
0x17a5   :  { %v2431_v13 = vadd.f32 %v3306_v37, %v2430_v10 }
0x17a6   :  { %v3129_v14 = vpop.f32.mrf.mxu0 }
0x17a7   :  { %v2509_v15 = vadd.f32 %v2505_v5, %v2431_v13 }
0x17a9   :  { %3286 = vtanh.f32 %v2509_v15  ;;  %v2721_v17 = vmul.f32 -1.442695, %v2509_v15 }
0x17ab   :  { %3288 = vpow2.f32 %v2721_v17 }
0x17b6   :  { %v3287_v16 = vpop.eup %3286 }
0x17b7   :  { %2519 = vrot.lane.b32.xlu0 %v3287_v16, %s3466_s4 }
0x17b8   :  { %v3289_v18 = vpop.eup %3288 }
0x17b9   :  { %v2513_v19 = vadd.f32 1.0, %v3289_v18 }
0x17bb   :  { %3290 = vrcp.f32 %v2513_v19 }
0x17c8   :  { %v3291_v20 = vpop.eup %3290 }
0x17c9   :  { %v2517_v24 = vmul.f32 %v3291_v20, %v2250_v60 }
0x1829   :  { %v2520_v22 = vpop.permute.xlu0 %2519 }
0x182a   :  { %v2522_v21 = vmul.f32 %v3291_v20, %v2520_v22 }
0x182c   :  { %2524 = vrot.lane.b32.xlu1 %v2522_v21, %s3466_s4 }
0x189e   :  { %v2525_v26 = vpop.permute.xlu1 %2524 }
0x189f   :  { %v2527_v27 = vadd.f32 %v2525_v26, %v2517_v24 }
0x18a1   :  { %3292 = vtanh.f32 %v2527_v27  ;;  %v2634_v36 = vrot.slane %v2527_v27, 2 }
0x18ae   :  { %v3293_v31 = vpop.eup %3292 }
0x18af   :  { %2530 = vrot.lane.b32.xlu0 %v3293_v31, %s3466_s4 }
0x18b3   :  { %2622 = vrot.lane.b32.xlu0 %v2357_v1, %s3468_s7 }
0x18b7   :  { %2630 = vrot.lane.b32.xlu0 %v2351_v63, %s3466_s4 }
0x1921   :  { %v2531_v34 = vpop.permute.xlu0 %2530 }
0x1922   :  { %v2533_v28 = vmul.f32 %v3291_v20, %v2531_v34 }
0x1924   :  { %2546 = vrot.lane.b32.xlu1 %v2533_v28, %s3468_s7  ;;  %v2625_v35 = vrot.slane %v2533_v28, 2 }
0x1925   :  { %v2623_v38 = vpop.permute.xlu0 %2622 }
0x1928   :  { %2626 = vrot.lane.b32.xlu1 %v2625_v35, %s3467_s2 }
0x1929   :  { %v2631_v48 = vpop.permute.xlu0 %2630 }
0x192c   :  { %2635 = vrot.lane.b32.xlu1 %v2634_v36, %s3468_s7 }
0x1996   :  { %v2547_v37 = vpop.permute.xlu1 %2546 }
0x1997   :  { %3150 = vmatmul.mubr.msk.f32.vlgmr.msra.gmra.mxu0 %vm233_vm1, %v2547_v37 }
0x199a   :  { %v2627_v6 = vpop.permute.xlu1 %2626 }
0x199b   :  { %v2638_v46 = vsel %vm233_vm1, %v2623_v38, %v2627_v6 }
0x199c   :  { %v2640_v50 = vsel %vm2639_vm3, %v2638_v46, %v2631_v48 }
0x199e   :  { %v2636_v49 = vpop.permute.xlu1 %2635 }
0x199f   :  { %v2642_v51 = vsel %vm2641_vm4, %v2640_v50, %v2636_v49 }
0x19a0   :  { %2643 = vst [vmem:[#allocation12 - $0x6] sm:$0xc0] %v2642_v51 }
0x19a1   :  { %3418 = shalt.err (!%p3415_p1)
}
0x19a2   :  { %2663 = dma.vmem_to_hbm [thread:$0]  %s2661_s19, 32, %s4089_s14, [#allocation13]   ;;  %v2722_v39 = vld [vmem:[%s4087_s12] ss:$0 sm:$0xff]  ;;  %vm2620_vm5 = vcmask 25600  }
0x19a3   :  { %s3470_s1 = smov [#allocation11]  }
0x19a4   :  { %s2650_s5 = sshll.u32 %s3470_s1, 4  ;;  %s2651_s5 = int_to_ptr.vmem [resolvable:$true] %s2650_s5 }
0x19a5   :  { %s3427_s3 = scalar_lea.vmem %s2651_s5, 32  ;;  %p3432_p3 = scmp.lt.s32.totalorder %s2651_s5, %s2651_s5 }
0x19a6   :  { %p3428_p2 = scmp.ne.s32.totalorder %s2651_s5, %s3427_s3  ;;  %p3433_p4 = scmp.lt.s32.totalorder %s3427_s3, %s3427_s3 }
0x19a8   :  { %p3434_p5 = por %p3433_p4, %p3432_p3 }
0x19aa   :  { %p3435_p6 = pnand %p3434_p5, %p3428_p2 }
0x1a57   :  { %v2616_v40 = vpop.f32.mrf.mxu0 }
0x1a58   :  { %v2617_v43 = vadd.f32 %v2722_v39, %v2616_v40 }
0x1a59   :  { %v3151_v45 = vpop.f32.mrf.mxu0 }
0x1a5a   :  { %2621 = vst.msk [vmem:[#allocation11] sm:$0x3] %vm2620_vm5, %v2617_v43 }
0x1a5b   :  { %3438 = shalt.err (!%p3435_p6)
}
0x1a5c   :  { %2653 = dma.vmem_to_hbm [thread:$0]  %s2651_s5, 32, %s4088_s13, [#allocation4]  }
0x1a5d   :  { %3453 = dma.done.wait [#allocation4], 32  }
0x1a5e   :  { %3454 = vsyncadd [#allocation4], 4294967264 }
0x1a5f   :  { %3455 = dma.done.wait [#allocation13], 32  }
0x1a60   :  { %3456 = vsyncadd [#allocation13], 4294967264 }
0x1a61   :  { %2670 = vsyncpa [#allocation3], 1 }
0x1a62   :  { %2671 = vsyncpa [#allocation6], 1 }
0x1a63   :  { %2672 = vsyncpa [#allocation9], 1 }
0x1a64   :  { %2673 = vsyncpa [#allocation4], 1 }
0x1a65   :  { %2674 = vsyncpa [#allocation13], 1 }

</bundles_post_ra>
